<compile_context>
chip_gen: v7x
topology: tpu7x:2x2x1
jax: 0.10.0
libtpu: 0.0.40
codegen_flags: <defaults>
</compile_context>

<pallas_src>
import math

import numpy as np
import jax
import jax.numpy as jnp
from jax import lax
from jax.experimental import pallas as pl
from jax.experimental.pallas import tpu as pltpu

EPS = 1e-5


# ------------------------------------------------------------------ in-kernel helpers

def _shift_rows(x, shift):
    """Shift rows (sublane axis) of a 2-D f32 tile by `shift` with zero fill.

    shift=+1: row o receives x[o-1] (row 0 zeroed) -> vertical conv tap i=0.
    shift=-1: row o receives x[o+1] (last row zeroed) -> vertical conv tap i=2.
    Uses the XLU (pltpu.roll) + VPU mask instead of an MXU 0/1-matrix matmul.
    """
    h = x.shape[0]
    rolled = pltpu.roll(x, shift % h, axis=0)
    rows = lax.broadcasted_iota(jnp.int32, x.shape, 0)
    if shift >= 0:
        mask = rows >= shift
    else:
        mask = rows < h + shift
    return jnp.where(mask, rolled, 0.0)


def _conv3_s1_bn(x, b_ref, c_ref):
    """3x3 conv (stride 1, pad 1) + folded BN on a lane-dense (H, W*Cin) f32 tile.

    b_ref: (3, W*Cin, Wo*Cout) bf16 banded horizontal-tap matrices (BN scale folded)
    c_ref: (1, Wo*Cout) f32 BN bias row.  Accumulation is f32.
    """
    x0 = _shift_rows(x, 1).astype(jnp.bfloat16)    # tap 0: input row o-1
    x1 = x.astype(jnp.bfloat16)                    # tap 1: input row o
    x2 = _shift_rows(x, -1).astype(jnp.bfloat16)   # tap 2: input row o+1
    acc = jnp.dot(x0, b_ref[0], preferred_element_type=jnp.float32)
    acc = acc + jnp.dot(x1, b_ref[1], preferred_element_type=jnp.float32)
    acc = acc + jnp.dot(x2, b_ref[2], preferred_element_type=jnp.float32)
    return acc + c_ref[...]


def _block_id(x, b1_ref, c1_ref, b2_ref, c2_ref):
    """BasicBlock with identity shortcut (stride 1)."""
    x = jnp.maximum(x, 0.0)
    out = jnp.maximum(_conv3_s1_bn(x, b1_ref, c1_ref), 0.0)
    out = _conv3_s1_bn(out, b2_ref, c2_ref)
    return out + x


def _block_ds(x, s_ref, b1_ref, c1_ref, b2_ref, c2_ref, d_ref, cd_ref, ho):
    """BasicBlock with 1x1-conv+BN downsample shortcut (strided).

    s_ref: (4*ho, H_in) f32 stacked 0/1 selection matrix — one matmul picks the
           three strided/zero-padded conv1 vertical taps AND the downsample rows.
    """
    x = jnp.maximum(x, 0.0)
    sel = jnp.dot(s_ref[...], x, preferred_element_type=jnp.float32)   # (4*ho, W*Cin)
    t0 = sel[0 * ho:1 * ho].astype(jnp.bfloat16)
    t1 = sel[1 * ho:2 * ho].astype(jnp.bfloat16)
    t2 = sel[2 * ho:3 * ho].astype(jnp.bfloat16)
    xd = sel[3 * ho:4 * ho].astype(jnp.bfloat16)
    out = jnp.dot(t0, b1_ref[0], preferred_element_type=jnp.float32)
    out = out + jnp.dot(t1, b1_ref[1], preferred_element_type=jnp.float32)
    out = out + jnp.dot(t2, b1_ref[2], preferred_element_type=jnp.float32)
    out = jnp.maximum(out + c1_ref[...], 0.0)
    out = _conv3_s1_bn(out, b2_ref, c2_ref)
    res = jnp.dot(xd, d_ref[...], preferred_element_type=jnp.float32) + cd_ref[...]
    return out + res


def _make_resnet_kernel(plan):
    """Build the single fused kernel for the given static block plan."""
    n_per_block = [7 if b['ds'] else 4 for b in plan]

    def kernel(*refs):
        x_ref, o_ref = refs[0], refs[-1]
        w = refs[1:-1]
        x = x_ref[...]                                   # (H, W*Cin) f32, one image
        # ---- stem: conv1 + bn1 (ReLU deferred to the first block's entry)
        x = _conv3_s1_bn(x, w[0], w[1])
        pos = 2
        # ---- residual blocks
        for blk, nw in zip(plan, n_per_block):
            a = w[pos:pos + nw]
            if blk['ds']:
                x = _block_ds(x, a[0], a[1], a[2], a[3], a[4], a[5], a[6], blk['ho'])
            else:
                x = _block_id(x, a[0], a[1], a[2], a[3])
            pos += nw
        # ---- head: relu -> fc (mean-over-w folded into GW) -> mean-over-h -> +bias
        gw_ref, fb_ref = w[pos], w[pos + 1]
        x = jnp.maximum(x, 0.0)
        y = jnp.dot(x.astype(jnp.bfloat16), gw_ref[...],
                    preferred_element_type=jnp.float32)          # (H_last, out_lanes)
        logits = jnp.mean(y, axis=0, keepdims=True) + fb_ref[...]  # (1, out_lanes)
        o_ref[...] = jnp.broadcast_to(logits, o_ref.shape)         # full-lane vst

    return kernel


# ------------------------------------------------------------------ pallas wrapper

def _const_spec(arr):
    """Full-array block that is identical for every grid step (fetched once)."""
    zeros = (0,) * arr.ndim
    return pl.BlockSpec(arr.shape, lambda n, _z=zeros: _z)


def resnet_pallas(x2d, fused, batch):
    flat = fused['flat']
    h_in, wcin = fused['h_in'], fused['w_in'] * fused['cin_pad']
    h_out, out_lanes = fused['h_out'], fused['out_lanes']
    kernel = _make_resnet_kernel(fused['plan'])
    in_specs = ([pl.BlockSpec((h_in, wcin), lambda n: (n, 0))]
                + [_const_spec(a) for a in flat])
    return pl.pallas_call(
        kernel,
        out_shape=jax.ShapeDtypeStruct((batch * h_out, out_lanes), jnp.float32),
        grid=(batch,),
        in_specs=in_specs,
        out_specs=pl.BlockSpec((h_out, out_lanes), lambda n: (n, 0)),
        compiler_params=pltpu.CompilerParams(dimension_semantics=("parallel",)),
    )(x2d, *flat)


# ------------------------------------------------------------------ parameter folding

def _bn_fold(bn):
    gamma = np.asarray(bn['gamma'], np.float32)
    beta = np.asarray(bn['beta'], np.float32)
    mean = np.asarray(bn['mean'], np.float32)
    var = np.asarray(bn['var'], np.float32)
    scale = gamma / np.sqrt(var + EPS)
    bias = beta - mean * scale
    return scale, bias


def _band3(w_oihw, scale, w_in, stride):
    """Banded (3, W_in*Cin, Wo*Cout) matrices for the 3 horizontal taps of a 3x3 conv."""
    w = np.asarray(w_oihw, np.float32)                 # (Cout, Cin, 3, 3) torch OIHW
    cout, cin = w.shape[0], w.shape[1]
    wo = (w_in + 2 - 3) // stride + 1
    B = np.zeros((3, w_in * cin, wo * cout), np.float32)
    for i in range(3):
        for o in range(wo):
            for j in range(3):
                wi = stride * o + j - 1                # padding = 1
                if 0 <= wi < w_in:
                    B[i, wi * cin:(wi + 1) * cin, o * cout:(o + 1) * cout] += \
                        w[:, :, i, j].T * scale[None, :]
    return B, wo


def _rows3(h_in, stride, h_out):
    """0/1 row-selection matrices for the 3 vertical taps (padding=1, stride s)."""
    S = np.zeros((3, h_out, h_in), np.float32)
    for i in range(3):
        for o in range(h_out):
            r = stride * o + i - 1
            if 0 <= r < h_in:
                S[i, o, r] = 1.0
    return S


def _band1(w_oihw, scale, w_in, stride):
    """(W_in*Cin, Wo*Cout) matrix for a 1x1 stride-s conv (downsample), BN folded."""
    w = np.asarray(w_oihw, np.float32)[:, :, 0, 0]     # (Cout, Cin)
    cout, cin = w.shape
    wo = (w_in - 1) // stride + 1
    D = np.zeros((w_in * cin, wo * cout), np.float32)
    for o in range(wo):
        wi = stride * o
        D[wi * cin:(wi + 1) * cin, o * cout:(o + 1) * cout] = w.T * scale[None, :]
    return D, wo


def _rows1(h_in, stride, h_out):
    S = np.zeros((h_out, h_in), np.float32)
    for o in range(h_out):
        S[o, stride * o] = 1.0
    return S


def _bias_row(bias, w_out):
    return np.tile(np.asarray(bias, np.float32), w_out).reshape(1, -1)


def prepare_fused(params, image_hw=(32, 32)):
    """Fold conv+BN into banded bf16 matrices / 0/1 selectors (runs once, host-side)."""
    H, W = image_hw
    CIN_PAD = 4  # pad RGB stem 3 -> 4 input channels so the stem tile is (H, 128)

    flat, plan = [], []

    def add(arr, dtype):
        flat.append(jnp.asarray(np.asarray(arr), dtype))

    # ---- stem: conv1 + bn1
    w0 = np.asarray(params['conv1_w'], np.float32)
    w0p = np.zeros((w0.shape[0], CIN_PAD, 3, 3), np.float32)
    w0p[:, :w0.shape[1]] = w0
    sc0, bi0 = _bn_fold(params['bn1'])
    B0, Wo = _band3(w0p, sc0, W, 1)
    add(B0, jnp.bfloat16)
    add(_bias_row(bi0, Wo), jnp.float32)
    W = Wo

    # ---- residual blocks
    for li in (1, 2, 3):
        for blk in params[f'layer{li}']:
            s = blk['stride']
            Ho = (H + 2 - 3) // s + 1
            sc1, bi1 = _bn_fold(blk['bn1'])
            B1, Wo = _band3(blk['conv1_w'], sc1, W, s)
            sc2, bi2 = _bn_fold(blk['bn2'])
            B2, _ = _band3(blk['conv2_w'], sc2, Wo, 1)
            has_ds = 'ds_w' in blk
            if has_ds:
                # stacked 0/1 selection: 3 conv1 vertical taps + downsample rows
                S_all = np.concatenate(
                    [_rows3(H, s, Ho).reshape(3 * Ho, H), _rows1(H, s, Ho)], axis=0)
                scd, bid = _bn_fold(blk['ds_bn'])
                D, _ = _band1(blk['ds_w'], scd, W, s)
                add(S_all, jnp.float32)
                add(B1, jnp.bfloat16); add(_bias_row(bi1, Wo), jnp.float32)
                add(B2, jnp.bfloat16); add(_bias_row(bi2, Wo), jnp.float32)
                add(D, jnp.bfloat16);  add(_bias_row(bid, Wo), jnp.float32)
            else:
                assert s == 1
                add(B1, jnp.bfloat16); add(_bias_row(bi1, Wo), jnp.float32)
                add(B2, jnp.bfloat16); add(_bias_row(bi2, Wo), jnp.float32)
            plan.append(dict(ds=has_ds, ho=Ho))
            H, W = Ho, Wo

    assert H == 8 and W == 8, "AvgPool2d(8) expects an 8x8 final feature map"

    # ---- head: relu -> avgpool(8) -> fc, folded into one (W*C, out_lanes) matrix
    fc_w = np.asarray(params['fc_w'], np.float32)      # (num_classes, c_last)
    fc_b = np.asarray(params['fc_b'], np.float32)
    nc, c_last = fc_w.shape
    out_lanes = max(128, ((nc + 127) // 128) * 128)    # full-lane fc output, slice outside
    G = np.zeros((W * c_last, c_last), np.float32)     # mean over w, folded
    for w_ in range(W):
        G[w_ * c_last:(w_ + 1) * c_last, :] = np.eye(c_last, dtype=np.float32) / W
    GW = np.zeros((W * c_last, out_lanes), np.float32)
    GW[:, :nc] = G @ fc_w.T
    bpad = np.zeros((1, out_lanes), np.float32)
    bpad[0, :nc] = fc_b
    add(GW, jnp.bfloat16)
    add(bpad, jnp.float32)

    return dict(flat=flat, plan=plan,
                h_in=image_hw[0], w_in=image_hw[1], cin_pad=CIN_PAD,
                h_out=H, out_lanes=out_lanes, num_classes=nc)


# ------------------------------------------------------------------ model

def init_params(key, depth=8, num_filters=(4, 4, 8, 16), num_classes=10):
    assert (depth - 2) % 6 == 0, "BasicBlock depth must be 6n+2"
    n = (depth - 2) // 6
    keys = iter(jax.random.split(key, 256))

    def conv_w(cout, cin, k):
        std = math.sqrt(2.0 / (k * k * cout))
        return jax.random.normal(next(keys), (cout, cin, k, k), jnp.float32) * std

    def bn_init(c):
        return dict(gamma=jnp.ones((c,), jnp.float32), beta=jnp.zeros((c,), jnp.float32),
                    mean=jnp.zeros((c,), jnp.float32), var=jnp.ones((c,), jnp.float32))

    params = {}
    inplanes = num_filters[0]
    params['conv1_w'] = conv_w(inplanes, 3, 3)
    params['bn1'] = bn_init(inplanes)

    for li, (planes, stride) in enumerate(zip(num_filters[1:], (1, 2, 2)), start=1):
        blocks = []
        for bi in range(n):
            s = stride if bi == 0 else 1
            blk = {'stride': s,
                   'conv1_w': conv_w(planes, inplanes, 3), 'bn1': bn_init(planes),
                   'conv2_w': conv_w(planes, planes, 3), 'bn2': bn_init(planes)}
            if s != 1 or inplanes != planes:              # downsample: 1x1 conv + BN
                blk['ds_w'] = conv_w(planes, inplanes, 1)
                blk['ds_bn'] = bn_init(planes)
            inplanes = planes
            blocks.append(blk)
        params[f'layer{li}'] = blocks

    bound = 1.0 / math.sqrt(num_filters[3])
    params['fc_w'] = jax.random.uniform(next(keys), (num_classes, num_filters[3]),
                                        jnp.float32, -bound, bound)
    params['fc_b'] = jax.random.uniform(next(keys), (num_classes,),
                                        jnp.float32, -bound, bound)
    return params


def resnet_forward(fused, x_nchw):
    # PyTorch: conv1 -> bn1 -> layer1 -> layer2 -> layer3 -> relu -> avgpool(8) -> fc
    N, C, H, W = x_nchw.shape
    cp = fused['cin_pad']
    x = jnp.transpose(x_nchw, (0, 2, 3, 1)).astype(jnp.float32)        # NHWC
    if cp > C:
        x = jnp.pad(x, ((0, 0), (0, 0), (0, 0), (0, cp - C)))
    x2d = x.reshape(N * H, W * cp)                                     # lane-dense layout
    out = resnet_pallas(x2d, fused, N)                                 # (N*h_out, out_lanes)
    out = out.reshape(N, fused['h_out'], fused['out_lanes'])[:, 0, :fused['num_classes']]
    return out


if __name__ == "__main__":
    key = jax.random.PRNGKey(0)
    pkey, xkey = jax.random.split(key)

    # depth=8 (one BasicBlock per stage), small filter counts; CIFAR-shaped 32x32 input
    # so AvgPool2d(8) sees exactly an 8x8 map after the two stride-2 stages.
    params = init_params(pkey, depth=8, num_filters=(4, 4, 8, 16), num_classes=10)
    x = jax.random.normal(xkey, (2, 3, 32, 32), jnp.float32)

    fused = prepare_fused(params, image_hw=(32, 32))
    fwd = jax.jit(lambda inp: resnet_forward(fused, inp))
    out = jax.block_until_ready(fwd(x))
    assert out.shape == (2, 10) and out.dtype == jnp.float32
    print("KERNEL_OK")
</pallas_src>

<mosaic_0001>
module attributes {stable_mosaic.version = 11 : i64} {
  func.func @kernel(%arg0: i32, %arg1: memref<32x128xf32, #tpu.memory_space<vmem>>, %arg2: memref<3x128x128xbf16, #tpu.memory_space<vmem>>, %arg3: memref<1x128xf32, #tpu.memory_space<vmem>>, %arg4: memref<3x128x128xbf16, #tpu.memory_space<vmem>>, %arg5: memref<1x128xf32, #tpu.memory_space<vmem>>, %arg6: memref<3x128x128xbf16, #tpu.memory_space<vmem>>, %arg7: memref<1x128xf32, #tpu.memory_space<vmem>>, %arg8: memref<64x32xf32, #tpu.memory_space<vmem>>, %arg9: memref<3x128x128xbf16, #tpu.memory_space<vmem>>, %arg10: memref<1x128xf32, #tpu.memory_space<vmem>>, %arg11: memref<3x128x128xbf16, #tpu.memory_space<vmem>>, %arg12: memref<1x128xf32, #tpu.memory_space<vmem>>, %arg13: memref<128x128xbf16, #tpu.memory_space<vmem>>, %arg14: memref<1x128xf32, #tpu.memory_space<vmem>>, %arg15: memref<32x16xf32, #tpu.memory_space<vmem>>, %arg16: memref<3x128x128xbf16, #tpu.memory_space<vmem>>, %arg17: memref<1x128xf32, #tpu.memory_space<vmem>>, %arg18: memref<3x128x128xbf16, #tpu.memory_space<vmem>>, %arg19: memref<1x128xf32, #tpu.memory_space<vmem>>, %arg20: memref<128x128xbf16, #tpu.memory_space<vmem>>, %arg21: memref<1x128xf32, #tpu.memory_space<vmem>>, %arg22: memref<128x128xbf16, #tpu.memory_space<vmem>>, %arg23: memref<1x128xf32, #tpu.memory_space<vmem>>, %arg24: memref<8x128xf32, #tpu.memory_space<vmem>>) attributes {dimension_semantics = [#tpu.dimension_semantics<parallel>], iteration_bounds = array<i64: 2>, scalar_prefetch = 0 : i64, scratch_operands = 0 : i64, tpu.core_type = #tpu.core_type<tc>, window_params = [{transform_indices = @transform_0, window_bounds = array<i64: 32, 128>}, {pipeline_mode = #tpu.pipeline_mode<synchronous>, transform_indices = @transform_1, window_bounds = array<i64: 3, 128, 128>}, {pipeline_mode = #tpu.pipeline_mode<synchronous>, transform_indices = @transform_2, window_bounds = array<i64: 1, 128>}, {pipeline_mode = #tpu.pipeline_mode<synchronous>, transform_indices = @transform_3, window_bounds = array<i64: 3, 128, 128>}, {pipeline_mode = #tpu.pipeline_mode<synchronous>, transform_indices = @transform_4, window_bounds = array<i64: 1, 128>}, {pipeline_mode = #tpu.pipeline_mode<synchronous>, transform_indices = @transform_5, window_bounds = array<i64: 3, 128, 128>}, {pipeline_mode = #tpu.pipeline_mode<synchronous>, transform_indices = @transform_6, window_bounds = array<i64: 1, 128>}, {pipeline_mode = #tpu.pipeline_mode<synchronous>, transform_indices = @transform_7, window_bounds = array<i64: 64, 32>}, {pipeline_mode = #tpu.pipeline_mode<synchronous>, transform_indices = @transform_8, window_bounds = array<i64: 3, 128, 128>}, {pipeline_mode = #tpu.pipeline_mode<synchronous>, transform_indices = @transform_9, window_bounds = array<i64: 1, 128>}, {pipeline_mode = #tpu.pipeline_mode<synchronous>, transform_indices = @transform_10, window_bounds = array<i64: 3, 128, 128>}, {pipeline_mode = #tpu.pipeline_mode<synchronous>, transform_indices = @transform_11, window_bounds = array<i64: 1, 128>}, {pipeline_mode = #tpu.pipeline_mode<synchronous>, transform_indices = @transform_12, window_bounds = array<i64: 128, 128>}, {pipeline_mode = #tpu.pipeline_mode<synchronous>, transform_indices = @transform_13, window_bounds = array<i64: 1, 128>}, {pipeline_mode = #tpu.pipeline_mode<synchronous>, transform_indices = @transform_14, window_bounds = array<i64: 32, 16>}, {pipeline_mode = #tpu.pipeline_mode<synchronous>, transform_indices = @transform_15, window_bounds = array<i64: 3, 128, 128>}, {pipeline_mode = #tpu.pipeline_mode<synchronous>, transform_indices = @transform_16, window_bounds = array<i64: 1, 128>}, {pipeline_mode = #tpu.pipeline_mode<synchronous>, transform_indices = @transform_17, window_bounds = array<i64: 3, 128, 128>}, {pipeline_mode = #tpu.pipeline_mode<synchronous>, transform_indices = @transform_18, window_bounds = array<i64: 1, 128>}, {pipeline_mode = #tpu.pipeline_mode<synchronous>, transform_indices = @transform_19, window_bounds = array<i64: 128, 128>}, {pipeline_mode = #tpu.pipeline_mode<synchronous>, transform_indices = @transform_20, window_bounds = array<i64: 1, 128>}, {pipeline_mode = #tpu.pipeline_mode<synchronous>, transform_indices = @transform_21, window_bounds = array<i64: 128, 128>}, {pipeline_mode = #tpu.pipeline_mode<synchronous>, transform_indices = @transform_22, window_bounds = array<i64: 1, 128>}, {transform_indices = @transform_23, window_bounds = array<i64: 8, 128>}]} {
    %c0 = arith.constant 0 : index
    %c0_0 = arith.constant 0 : index
    %0 = vector.load %arg1[%c0, %c0_0] : memref<32x128xf32, #tpu.memory_space<vmem>>, vector<32x128xf32>
    %c1_i32 = arith.constant 1 : i32
    %1 = tpu.dynamic_rotate %0 by %c1_i32 dim 0 : vector<32x128xf32>, i32 -> vector<32x128xf32>
    %2 = tpu.iota {dimensions = array<i32: 0>} : vector<32x128xi32>
    %c1_i32_1 = arith.constant 1 : i32
    %3 = vector.broadcast %c1_i32_1 : i32 to vector<32x128xi32>
    %4 = arith.cmpi sge, %2, %3 : vector<32x128xi32>
    %cst = arith.constant 0.000000e+00 : f32
    %5 = vector.broadcast %cst : f32 to vector<32x128xf32>
    %6 = arith.select %4, %1, %5 : vector<32x128xi1>, vector<32x128xf32>
    %7 = arith.truncf %6 : vector<32x128xf32> to vector<32x128xbf16>
    %8 = arith.truncf %0 : vector<32x128xf32> to vector<32x128xbf16>
    %c31_i32 = arith.constant 31 : i32
    %9 = tpu.dynamic_rotate %0 by %c31_i32 dim 0 : vector<32x128xf32>, i32 -> vector<32x128xf32>
    %10 = tpu.iota {dimensions = array<i32: 0>} : vector<32x128xi32>
    %c31_i32_2 = arith.constant 31 : i32
    %11 = vector.broadcast %c31_i32_2 : i32 to vector<32x128xi32>
    %12 = arith.cmpi slt, %10, %11 : vector<32x128xi32>
    %cst_3 = arith.constant 0.000000e+00 : f32
    %13 = vector.broadcast %cst_3 : f32 to vector<32x128xf32>
    %14 = arith.select %12, %9, %13 : vector<32x128xi1>, vector<32x128xf32>
    %15 = arith.truncf %14 : vector<32x128xf32> to vector<32x128xbf16>
    %c0_4 = arith.constant 0 : index
    %c0_5 = arith.constant 0 : index
    %c0_6 = arith.constant 0 : index
    %16 = vector.load %arg2[%c0_4, %c0_5, %c0_6] : memref<3x128x128xbf16, #tpu.memory_space<vmem>>, vector<1x128x128xbf16>
    %17 = vector.shape_cast %16 : vector<1x128x128xbf16> to vector<128x128xbf16>
    %cst_7 = arith.constant dense<0.000000e+00> : vector<32x128xf32>
    %18 = tpu.matmul %7, %17, %cst_7 {dimension_numbers = #tpu.dot_dimension_numbers<[1], [0], [0], [1], [0, 0, 1, 1], [], []>} : vector<32x128xbf16>, vector<128x128xbf16>, vector<32x128xf32> -> vector<32x128xf32>
    %c1 = arith.constant 1 : index
    %c0_8 = arith.constant 0 : index
    %c0_9 = arith.constant 0 : index
    %19 = vector.load %arg2[%c1, %c0_8, %c0_9] : memref<3x128x128xbf16, #tpu.memory_space<vmem>>, vector<1x128x128xbf16>
    %20 = vector.shape_cast %19 : vector<1x128x128xbf16> to vector<128x128xbf16>
    %cst_10 = arith.constant dense<0.000000e+00> : vector<32x128xf32>
    %21 = tpu.matmul %8, %20, %cst_10 {dimension_numbers = #tpu.dot_dimension_numbers<[1], [0], [0], [1], [0, 0, 1, 1], [], []>} : vector<32x128xbf16>, vector<128x128xbf16>, vector<32x128xf32> -> vector<32x128xf32>
    %22 = arith.addf %18, %21 : vector<32x128xf32>
    %c2 = arith.constant 2 : index
    %c0_11 = arith.constant 0 : index
    %c0_12 = arith.constant 0 : index
    %23 = vector.load %arg2[%c2, %c0_11, %c0_12] : memref<3x128x128xbf16, #tpu.memory_space<vmem>>, vector<1x128x128xbf16>
    %24 = vector.shape_cast %23 : vector<1x128x128xbf16> to vector<128x128xbf16>
    %cst_13 = arith.constant dense<0.000000e+00> : vector<32x128xf32>
    %25 = tpu.matmul %15, %24, %cst_13 {dimension_numbers = #tpu.dot_dimension_numbers<[1], [0], [0], [1], [0, 0, 1, 1], [], []>} : vector<32x128xbf16>, vector<128x128xbf16>, vector<32x128xf32> -> vector<32x128xf32>
    %26 = arith.addf %22, %25 : vector<32x128xf32>
    %c0_14 = arith.constant 0 : index
    %c0_15 = arith.constant 0 : index
    %27 = vector.load %arg3[%c0_14, %c0_15] : memref<1x128xf32, #tpu.memory_space<vmem>>, vector<1x128xf32>
    %28 = vector.broadcast %27 : vector<1x128xf32> to vector<32x128xf32>
    %29 = arith.addf %26, %28 : vector<32x128xf32>
    %cst_16 = arith.constant 0.000000e+00 : f32
    %30 = vector.broadcast %cst_16 : f32 to vector<32x128xf32>
    %31 = arith.maximumf %29, %30 : vector<32x128xf32>
    %c1_i32_17 = arith.constant 1 : i32
    %32 = tpu.dynamic_rotate %31 by %c1_i32_17 dim 0 : vector<32x128xf32>, i32 -> vector<32x128xf32>
    %33 = tpu.iota {dimensions = array<i32: 0>} : vector<32x128xi32>
    %c1_i32_18 = arith.constant 1 : i32
    %34 = vector.broadcast %c1_i32_18 : i32 to vector<32x128xi32>
    %35 = arith.cmpi sge, %33, %34 : vector<32x128xi32>
    %cst_19 = arith.constant 0.000000e+00 : f32
    %36 = vector.broadcast %cst_19 : f32 to vector<32x128xf32>
    %37 = arith.select %35, %32, %36 : vector<32x128xi1>, vector<32x128xf32>
    %38 = arith.truncf %37 : vector<32x128xf32> to vector<32x128xbf16>
    %39 = arith.truncf %31 : vector<32x128xf32> to vector<32x128xbf16>
    %c31_i32_20 = arith.constant 31 : i32
    %40 = tpu.dynamic_rotate %31 by %c31_i32_20 dim 0 : vector<32x128xf32>, i32 -> vector<32x128xf32>
    %41 = tpu.iota {dimensions = array<i32: 0>} : vector<32x128xi32>
    %c31_i32_21 = arith.constant 31 : i32
    %42 = vector.broadcast %c31_i32_21 : i32 to vector<32x128xi32>
    %43 = arith.cmpi slt, %41, %42 : vector<32x128xi32>
    %cst_22 = arith.constant 0.000000e+00 : f32
    %44 = vector.broadcast %cst_22 : f32 to vector<32x128xf32>
    %45 = arith.select %43, %40, %44 : vector<32x128xi1>, vector<32x128xf32>
    %46 = arith.truncf %45 : vector<32x128xf32> to vector<32x128xbf16>
    %c0_23 = arith.constant 0 : index
    %c0_24 = arith.constant 0 : index
    %c0_25 = arith.constant 0 : index
    %47 = vector.load %arg4[%c0_23, %c0_24, %c0_25] : memref<3x128x128xbf16, #tpu.memory_space<vmem>>, vector<1x128x128xbf16>
    %48 = vector.shape_cast %47 : vector<1x128x128xbf16> to vector<128x128xbf16>
    %cst_26 = arith.constant dense<0.000000e+00> : vector<32x128xf32>
    %49 = tpu.matmul %38, %48, %cst_26 {dimension_numbers = #tpu.dot_dimension_numbers<[1], [0], [0], [1], [0, 0, 1, 1], [], []>} : vector<32x128xbf16>, vector<128x128xbf16>, vector<32x128xf32> -> vector<32x128xf32>
    %c1_27 = arith.constant 1 : index
    %c0_28 = arith.constant 0 : index
    %c0_29 = arith.constant 0 : index
    %50 = vector.load %arg4[%c1_27, %c0_28, %c0_29] : memref<3x128x128xbf16, #tpu.memory_space<vmem>>, vector<1x128x128xbf16>
    %51 = vector.shape_cast %50 : vector<1x128x128xbf16> to vector<128x128xbf16>
    %cst_30 = arith.constant dense<0.000000e+00> : vector<32x128xf32>
    %52 = tpu.matmul %39, %51, %cst_30 {dimension_numbers = #tpu.dot_dimension_numbers<[1], [0], [0], [1], [0, 0, 1, 1], [], []>} : vector<32x128xbf16>, vector<128x128xbf16>, vector<32x128xf32> -> vector<32x128xf32>
    %53 = arith.addf %49, %52 : vector<32x128xf32>
    %c2_31 = arith.constant 2 : index
    %c0_32 = arith.constant 0 : index
    %c0_33 = arith.constant 0 : index
    %54 = vector.load %arg4[%c2_31, %c0_32, %c0_33] : memref<3x128x128xbf16, #tpu.memory_space<vmem>>, vector<1x128x128xbf16>
    %55 = vector.shape_cast %54 : vector<1x128x128xbf16> to vector<128x128xbf16>
    %cst_34 = arith.constant dense<0.000000e+00> : vector<32x128xf32>
    %56 = tpu.matmul %46, %55, %cst_34 {dimension_numbers = #tpu.dot_dimension_numbers<[1], [0], [0], [1], [0, 0, 1, 1], [], []>} : vector<32x128xbf16>, vector<128x128xbf16>, vector<32x128xf32> -> vector<32x128xf32>
    %57 = arith.addf %53, %56 : vector<32x128xf32>
    %c0_35 = arith.constant 0 : index
    %c0_36 = arith.constant 0 : index
    %58 = vector.load %arg5[%c0_35, %c0_36] : memref<1x128xf32, #tpu.memory_space<vmem>>, vector<1x128xf32>
    %59 = vector.broadcast %58 : vector<1x128xf32> to vector<32x128xf32>
    %60 = arith.addf %57, %59 : vector<32x128xf32>
    %cst_37 = arith.constant 0.000000e+00 : f32
    %61 = vector.broadcast %cst_37 : f32 to vector<32x128xf32>
    %62 = arith.maximumf %60, %61 : vector<32x128xf32>
    %c1_i32_38 = arith.constant 1 : i32
    %63 = tpu.dynamic_rotate %62 by %c1_i32_38 dim 0 : vector<32x128xf32>, i32 -> vector<32x128xf32>
    %64 = tpu.iota {dimensions = array<i32: 0>} : vector<32x128xi32>
    %c1_i32_39 = arith.constant 1 : i32
    %65 = vector.broadcast %c1_i32_39 : i32 to vector<32x128xi32>
    %66 = arith.cmpi sge, %64, %65 : vector<32x128xi32>
    %cst_40 = arith.constant 0.000000e+00 : f32
    %67 = vector.broadcast %cst_40 : f32 to vector<32x128xf32>
    %68 = arith.select %66, %63, %67 : vector<32x128xi1>, vector<32x128xf32>
    %69 = arith.truncf %68 : vector<32x128xf32> to vector<32x128xbf16>
    %70 = arith.truncf %62 : vector<32x128xf32> to vector<32x128xbf16>
    %c31_i32_41 = arith.constant 31 : i32
    %71 = tpu.dynamic_rotate %62 by %c31_i32_41 dim 0 : vector<32x128xf32>, i32 -> vector<32x128xf32>
    %72 = tpu.iota {dimensions = array<i32: 0>} : vector<32x128xi32>
    %c31_i32_42 = arith.constant 31 : i32
    %73 = vector.broadcast %c31_i32_42 : i32 to vector<32x128xi32>
    %74 = arith.cmpi slt, %72, %73 : vector<32x128xi32>
    %cst_43 = arith.constant 0.000000e+00 : f32
    %75 = vector.broadcast %cst_43 : f32 to vector<32x128xf32>
    %76 = arith.select %74, %71, %75 : vector<32x128xi1>, vector<32x128xf32>
    %77 = arith.truncf %76 : vector<32x128xf32> to vector<32x128xbf16>
    %c0_44 = arith.constant 0 : index
    %c0_45 = arith.constant 0 : index
    %c0_46 = arith.constant 0 : index
    %78 = vector.load %arg6[%c0_44, %c0_45, %c0_46] : memref<3x128x128xbf16, #tpu.memory_space<vmem>>, vector<1x128x128xbf16>
    %79 = vector.shape_cast %78 : vector<1x128x128xbf16> to vector<128x128xbf16>
    %cst_47 = arith.constant dense<0.000000e+00> : vector<32x128xf32>
    %80 = tpu.matmul %69, %79, %cst_47 {dimension_numbers = #tpu.dot_dimension_numbers<[1], [0], [0], [1], [0, 0, 1, 1], [], []>} : vector<32x128xbf16>, vector<128x128xbf16>, vector<32x128xf32> -> vector<32x128xf32>
    %c1_48 = arith.constant 1 : index
    %c0_49 = arith.constant 0 : index
    %c0_50 = arith.constant 0 : index
    %81 = vector.load %arg6[%c1_48, %c0_49, %c0_50] : memref<3x128x128xbf16, #tpu.memory_space<vmem>>, vector<1x128x128xbf16>
    %82 = vector.shape_cast %81 : vector<1x128x128xbf16> to vector<128x128xbf16>
    %cst_51 = arith.constant dense<0.000000e+00> : vector<32x128xf32>
    %83 = tpu.matmul %70, %82, %cst_51 {dimension_numbers = #tpu.dot_dimension_numbers<[1], [0], [0], [1], [0, 0, 1, 1], [], []>} : vector<32x128xbf16>, vector<128x128xbf16>, vector<32x128xf32> -> vector<32x128xf32>
    %84 = arith.addf %80, %83 : vector<32x128xf32>
    %c2_52 = arith.constant 2 : index
    %c0_53 = arith.constant 0 : index
    %c0_54 = arith.constant 0 : index
    %85 = vector.load %arg6[%c2_52, %c0_53, %c0_54] : memref<3x128x128xbf16, #tpu.memory_space<vmem>>, vector<1x128x128xbf16>
    %86 = vector.shape_cast %85 : vector<1x128x128xbf16> to vector<128x128xbf16>
    %cst_55 = arith.constant dense<0.000000e+00> : vector<32x128xf32>
    %87 = tpu.matmul %77, %86, %cst_55 {dimension_numbers = #tpu.dot_dimension_numbers<[1], [0], [0], [1], [0, 0, 1, 1], [], []>} : vector<32x128xbf16>, vector<128x128xbf16>, vector<32x128xf32> -> vector<32x128xf32>
    %88 = arith.addf %84, %87 : vector<32x128xf32>
    %c0_56 = arith.constant 0 : index
    %c0_57 = arith.constant 0 : index
    %89 = vector.load %arg7[%c0_56, %c0_57] : memref<1x128xf32, #tpu.memory_space<vmem>>, vector<1x128xf32>
    %90 = vector.broadcast %89 : vector<1x128xf32> to vector<32x128xf32>
    %91 = arith.addf %88, %90 : vector<32x128xf32>
    %92 = arith.addf %91, %31 : vector<32x128xf32>
    %cst_58 = arith.constant 0.000000e+00 : f32
    %93 = vector.broadcast %cst_58 : f32 to vector<32x128xf32>
    %94 = arith.maximumf %92, %93 : vector<32x128xf32>
    %c0_59 = arith.constant 0 : index
    %c0_60 = arith.constant 0 : index
    %95 = vector.load %arg8[%c0_59, %c0_60] : memref<64x32xf32, #tpu.memory_space<vmem>>, vector<64x32xf32>
    %cst_61 = arith.constant dense<0.000000e+00> : vector<64x128xf32>
    %96 = tpu.matmul %95, %94, %cst_61 {dimension_numbers = #tpu.dot_dimension_numbers<[1], [0], [0], [1], [0, 0, 1, 1], [], []>} : vector<64x32xf32>, vector<32x128xf32>, vector<64x128xf32> -> vector<64x128xf32>
    %97 = vector.extract_strided_slice %96 {offsets = [0, 0], sizes = [16, 128], strides = [1, 1]} : vector<64x128xf32> to vector<16x128xf32>
    %98 = arith.truncf %97 : vector<16x128xf32> to vector<16x128xbf16>
    %99 = vector.extract_strided_slice %96 {offsets = [16, 0], sizes = [16, 128], strides = [1, 1]} : vector<64x128xf32> to vector<16x128xf32>
    %100 = arith.truncf %99 : vector<16x128xf32> to vector<16x128xbf16>
    %101 = vector.extract_strided_slice %96 {offsets = [32, 0], sizes = [16, 128], strides = [1, 1]} : vector<64x128xf32> to vector<16x128xf32>
    %102 = arith.truncf %101 : vector<16x128xf32> to vector<16x128xbf16>
    %103 = vector.extract_strided_slice %96 {offsets = [48, 0], sizes = [16, 128], strides = [1, 1]} : vector<64x128xf32> to vector<16x128xf32>
    %104 = arith.truncf %103 : vector<16x128xf32> to vector<16x128xbf16>
    %c0_62 = arith.constant 0 : index
    %c0_63 = arith.constant 0 : index
    %c0_64 = arith.constant 0 : index
    %105 = vector.load %arg9[%c0_62, %c0_63, %c0_64] : memref<3x128x128xbf16, #tpu.memory_space<vmem>>, vector<1x128x128xbf16>
    %106 = vector.shape_cast %105 : vector<1x128x128xbf16> to vector<128x128xbf16>
    %cst_65 = arith.constant dense<0.000000e+00> : vector<16x128xf32>
    %107 = tpu.matmul %98, %106, %cst_65 {dimension_numbers = #tpu.dot_dimension_numbers<[1], [0], [0], [1], [0, 0, 1, 1], [], []>} : vector<16x128xbf16>, vector<128x128xbf16>, vector<16x128xf32> -> vector<16x128xf32>
    %c1_66 = arith.constant 1 : index
    %c0_67 = arith.constant 0 : index
    %c0_68 = arith.constant 0 : index
    %108 = vector.load %arg9[%c1_66, %c0_67, %c0_68] : memref<3x128x128xbf16, #tpu.memory_space<vmem>>, vector<1x128x128xbf16>
    %109 = vector.shape_cast %108 : vector<1x128x128xbf16> to vector<128x128xbf16>
    %cst_69 = arith.constant dense<0.000000e+00> : vector<16x128xf32>
    %110 = tpu.matmul %100, %109, %cst_69 {dimension_numbers = #tpu.dot_dimension_numbers<[1], [0], [0], [1], [0, 0, 1, 1], [], []>} : vector<16x128xbf16>, vector<128x128xbf16>, vector<16x128xf32> -> vector<16x128xf32>
    %111 = arith.addf %107, %110 : vector<16x128xf32>
    %c2_70 = arith.constant 2 : index
    %c0_71 = arith.constant 0 : index
    %c0_72 = arith.constant 0 : index
    %112 = vector.load %arg9[%c2_70, %c0_71, %c0_72] : memref<3x128x128xbf16, #tpu.memory_space<vmem>>, vector<1x128x128xbf16>
    %113 = vector.shape_cast %112 : vector<1x128x128xbf16> to vector<128x128xbf16>
    %cst_73 = arith.constant dense<0.000000e+00> : vector<16x128xf32>
    %114 = tpu.matmul %102, %113, %cst_73 {dimension_numbers = #tpu.dot_dimension_numbers<[1], [0], [0], [1], [0, 0, 1, 1], [], []>} : vector<16x128xbf16>, vector<128x128xbf16>, vector<16x128xf32> -> vector<16x128xf32>
    %115 = arith.addf %111, %114 : vector<16x128xf32>
    %c0_74 = arith.constant 0 : index
    %c0_75 = arith.constant 0 : index
    %116 = vector.load %arg10[%c0_74, %c0_75] : memref<1x128xf32, #tpu.memory_space<vmem>>, vector<1x128xf32>
    %117 = vector.broadcast %116 : vector<1x128xf32> to vector<16x128xf32>
    %118 = arith.addf %115, %117 : vector<16x128xf32>
    %cst_76 = arith.constant 0.000000e+00 : f32
    %119 = vector.broadcast %cst_76 : f32 to vector<16x128xf32>
    %120 = arith.maximumf %118, %119 : vector<16x128xf32>
    %c1_i32_77 = arith.constant 1 : i32
    %121 = tpu.dynamic_rotate %120 by %c1_i32_77 dim 0 : vector<16x128xf32>, i32 -> vector<16x128xf32>
    %122 = tpu.iota {dimensions = array<i32: 0>} : vector<16x128xi32>
    %c1_i32_78 = arith.constant 1 : i32
    %123 = vector.broadcast %c1_i32_78 : i32 to vector<16x128xi32>
    %124 = arith.cmpi sge, %122, %123 : vector<16x128xi32>
    %cst_79 = arith.constant 0.000000e+00 : f32
    %125 = vector.broadcast %cst_79 : f32 to vector<16x128xf32>
    %126 = arith.select %124, %121, %125 : vector<16x128xi1>, vector<16x128xf32>
    %127 = arith.truncf %126 : vector<16x128xf32> to vector<16x128xbf16>
    %128 = arith.truncf %120 : vector<16x128xf32> to vector<16x128xbf16>
    %c15_i32 = arith.constant 15 : i32
    %129 = tpu.dynamic_rotate %120 by %c15_i32 dim 0 : vector<16x128xf32>, i32 -> vector<16x128xf32>
    %130 = tpu.iota {dimensions = array<i32: 0>} : vector<16x128xi32>
    %c15_i32_80 = arith.constant 15 : i32
    %131 = vector.broadcast %c15_i32_80 : i32 to vector<16x128xi32>
    %132 = arith.cmpi slt, %130, %131 : vector<16x128xi32>
    %cst_81 = arith.constant 0.000000e+00 : f32
    %133 = vector.broadcast %cst_81 : f32 to vector<16x128xf32>
    %134 = arith.select %132, %129, %133 : vector<16x128xi1>, vector<16x128xf32>
    %135 = arith.truncf %134 : vector<16x128xf32> to vector<16x128xbf16>
    %c0_82 = arith.constant 0 : index
    %c0_83 = arith.constant 0 : index
    %c0_84 = arith.constant 0 : index
    %136 = vector.load %arg11[%c0_82, %c0_83, %c0_84] : memref<3x128x128xbf16, #tpu.memory_space<vmem>>, vector<1x128x128xbf16>
    %137 = vector.shape_cast %136 : vector<1x128x128xbf16> to vector<128x128xbf16>
    %cst_85 = arith.constant dense<0.000000e+00> : vector<16x128xf32>
    %138 = tpu.matmul %127, %137, %cst_85 {dimension_numbers = #tpu.dot_dimension_numbers<[1], [0], [0], [1], [0, 0, 1, 1], [], []>} : vector<16x128xbf16>, vector<128x128xbf16>, vector<16x128xf32> -> vector<16x128xf32>
    %c1_86 = arith.constant 1 : index
    %c0_87 = arith.constant 0 : index
    %c0_88 = arith.constant 0 : index
    %139 = vector.load %arg11[%c1_86, %c0_87, %c0_88] : memref<3x128x128xbf16, #tpu.memory_space<vmem>>, vector<1x128x128xbf16>
    %140 = vector.shape_cast %139 : vector<1x128x128xbf16> to vector<128x128xbf16>
    %cst_89 = arith.constant dense<0.000000e+00> : vector<16x128xf32>
    %141 = tpu.matmul %128, %140, %cst_89 {dimension_numbers = #tpu.dot_dimension_numbers<[1], [0], [0], [1], [0, 0, 1, 1], [], []>} : vector<16x128xbf16>, vector<128x128xbf16>, vector<16x128xf32> -> vector<16x128xf32>
    %142 = arith.addf %138, %141 : vector<16x128xf32>
    %c2_90 = arith.constant 2 : index
    %c0_91 = arith.constant 0 : index
    %c0_92 = arith.constant 0 : index
    %143 = vector.load %arg11[%c2_90, %c0_91, %c0_92] : memref<3x128x128xbf16, #tpu.memory_space<vmem>>, vector<1x128x128xbf16>
    %144 = vector.shape_cast %143 : vector<1x128x128xbf16> to vector<128x128xbf16>
    %cst_93 = arith.constant dense<0.000000e+00> : vector<16x128xf32>
    %145 = tpu.matmul %135, %144, %cst_93 {dimension_numbers = #tpu.dot_dimension_numbers<[1], [0], [0], [1], [0, 0, 1, 1], [], []>} : vector<16x128xbf16>, vector<128x128xbf16>, vector<16x128xf32> -> vector<16x128xf32>
    %146 = arith.addf %142, %145 : vector<16x128xf32>
    %c0_94 = arith.constant 0 : index
    %c0_95 = arith.constant 0 : index
    %147 = vector.load %arg12[%c0_94, %c0_95] : memref<1x128xf32, #tpu.memory_space<vmem>>, vector<1x128xf32>
    %148 = vector.broadcast %147 : vector<1x128xf32> to vector<16x128xf32>
    %149 = arith.addf %146, %148 : vector<16x128xf32>
    %c0_96 = arith.constant 0 : index
    %c0_97 = arith.constant 0 : index
    %150 = vector.load %arg13[%c0_96, %c0_97] : memref<128x128xbf16, #tpu.memory_space<vmem>>, vector<128x128xbf16>
    %cst_98 = arith.constant dense<0.000000e+00> : vector<16x128xf32>
    %151 = tpu.matmul %104, %150, %cst_98 {dimension_numbers = #tpu.dot_dimension_numbers<[1], [0], [0], [1], [0, 0, 1, 1], [], []>} : vector<16x128xbf16>, vector<128x128xbf16>, vector<16x128xf32> -> vector<16x128xf32>
    %c0_99 = arith.constant 0 : index
    %c0_100 = arith.constant 0 : index
    %152 = vector.load %arg14[%c0_99, %c0_100] : memref<1x128xf32, #tpu.memory_space<vmem>>, vector<1x128xf32>
    %153 = vector.broadcast %152 : vector<1x128xf32> to vector<16x128xf32>
    %154 = arith.addf %151, %153 : vector<16x128xf32>
    %155 = arith.addf %149, %154 : vector<16x128xf32>
    %cst_101 = arith.constant 0.000000e+00 : f32
    %156 = vector.broadcast %cst_101 : f32 to vector<16x128xf32>
    %157 = arith.maximumf %155, %156 : vector<16x128xf32>
    %c0_102 = arith.constant 0 : index
    %c0_103 = arith.constant 0 : index
    %158 = vector.load %arg15[%c0_102, %c0_103] : memref<32x16xf32, #tpu.memory_space<vmem>>, vector<32x16xf32>
    %cst_104 = arith.constant dense<0.000000e+00> : vector<32x128xf32>
    %159 = tpu.matmul %158, %157, %cst_104 {dimension_numbers = #tpu.dot_dimension_numbers<[1], [0], [0], [1], [0, 0, 1, 1], [], []>} : vector<32x16xf32>, vector<16x128xf32>, vector<32x128xf32> -> vector<32x128xf32>
    %160 = vector.extract_strided_slice %159 {offsets = [0, 0], sizes = [8, 128], strides = [1, 1]} : vector<32x128xf32> to vector<8x128xf32>
    %161 = arith.truncf %160 : vector<8x128xf32> to vector<8x128xbf16>
    %162 = vector.extract_strided_slice %159 {offsets = [8, 0], sizes = [8, 128], strides = [1, 1]} : vector<32x128xf32> to vector<8x128xf32>
    %163 = arith.truncf %162 : vector<8x128xf32> to vector<8x128xbf16>
    %164 = vector.extract_strided_slice %159 {offsets = [16, 0], sizes = [8, 128], strides = [1, 1]} : vector<32x128xf32> to vector<8x128xf32>
    %165 = arith.truncf %164 : vector<8x128xf32> to vector<8x128xbf16>
    %166 = vector.extract_strided_slice %159 {offsets = [24, 0], sizes = [8, 128], strides = [1, 1]} : vector<32x128xf32> to vector<8x128xf32>
    %167 = arith.truncf %166 : vector<8x128xf32> to vector<8x128xbf16>
    %c0_105 = arith.constant 0 : index
    %c0_106 = arith.constant 0 : index
    %c0_107 = arith.constant 0 : index
    %168 = vector.load %arg16[%c0_105, %c0_106, %c0_107] : memref<3x128x128xbf16, #tpu.memory_space<vmem>>, vector<1x128x128xbf16>
    %169 = vector.shape_cast %168 : vector<1x128x128xbf16> to vector<128x128xbf16>
    %cst_108 = arith.constant dense<0.000000e+00> : vector<8x128xf32>
    %170 = tpu.matmul %161, %169, %cst_108 {dimension_numbers = #tpu.dot_dimension_numbers<[1], [0], [0], [1], [0, 0, 1, 1], [], []>} : vector<8x128xbf16>, vector<128x128xbf16>, vector<8x128xf32> -> vector<8x128xf32>
    %c1_109 = arith.constant 1 : index
    %c0_110 = arith.constant 0 : index
    %c0_111 = arith.constant 0 : index
    %171 = vector.load %arg16[%c1_109, %c0_110, %c0_111] : memref<3x128x128xbf16, #tpu.memory_space<vmem>>, vector<1x128x128xbf16>
    %172 = vector.shape_cast %171 : vector<1x128x128xbf16> to vector<128x128xbf16>
    %cst_112 = arith.constant dense<0.000000e+00> : vector<8x128xf32>
    %173 = tpu.matmul %163, %172, %cst_112 {dimension_numbers = #tpu.dot_dimension_numbers<[1], [0], [0], [1], [0, 0, 1, 1], [], []>} : vector<8x128xbf16>, vector<128x128xbf16>, vector<8x128xf32> -> vector<8x128xf32>
    %174 = arith.addf %170, %173 : vector<8x128xf32>
    %c2_113 = arith.constant 2 : index
    %c0_114 = arith.constant 0 : index
    %c0_115 = arith.constant 0 : index
    %175 = vector.load %arg16[%c2_113, %c0_114, %c0_115] : memref<3x128x128xbf16, #tpu.memory_space<vmem>>, vector<1x128x128xbf16>
    %176 = vector.shape_cast %175 : vector<1x128x128xbf16> to vector<128x128xbf16>
    %cst_116 = arith.constant dense<0.000000e+00> : vector<8x128xf32>
    %177 = tpu.matmul %165, %176, %cst_116 {dimension_numbers = #tpu.dot_dimension_numbers<[1], [0], [0], [1], [0, 0, 1, 1], [], []>} : vector<8x128xbf16>, vector<128x128xbf16>, vector<8x128xf32> -> vector<8x128xf32>
    %178 = arith.addf %174, %177 : vector<8x128xf32>
    %c0_117 = arith.constant 0 : index
    %c0_118 = arith.constant 0 : index
    %179 = vector.load %arg17[%c0_117, %c0_118] : memref<1x128xf32, #tpu.memory_space<vmem>>, vector<1x128xf32>
    %180 = vector.broadcast %179 : vector<1x128xf32> to vector<8x128xf32>
    %181 = arith.addf %178, %180 : vector<8x128xf32>
    %cst_119 = arith.constant 0.000000e+00 : f32
    %182 = vector.broadcast %cst_119 : f32 to vector<8x128xf32>
    %183 = arith.maximumf %181, %182 : vector<8x128xf32>
    %c1_i32_120 = arith.constant 1 : i32
    %184 = tpu.dynamic_rotate %183 by %c1_i32_120 dim 0 : vector<8x128xf32>, i32 -> vector<8x128xf32>
    %185 = tpu.iota {dimensions = array<i32: 0>} : vector<8x128xi32>
    %c1_i32_121 = arith.constant 1 : i32
    %186 = vector.broadcast %c1_i32_121 : i32 to vector<8x128xi32>
    %187 = arith.cmpi sge, %185, %186 : vector<8x128xi32>
    %cst_122 = arith.constant 0.000000e+00 : f32
    %188 = vector.broadcast %cst_122 : f32 to vector<8x128xf32>
    %189 = arith.select %187, %184, %188 : vector<8x128xi1>, vector<8x128xf32>
    %190 = arith.truncf %189 : vector<8x128xf32> to vector<8x128xbf16>
    %191 = arith.truncf %183 : vector<8x128xf32> to vector<8x128xbf16>
    %c7_i32 = arith.constant 7 : i32
    %192 = tpu.dynamic_rotate %183 by %c7_i32 dim 0 : vector<8x128xf32>, i32 -> vector<8x128xf32>
    %193 = tpu.iota {dimensions = array<i32: 0>} : vector<8x128xi32>
    %c7_i32_123 = arith.constant 7 : i32
    %194 = vector.broadcast %c7_i32_123 : i32 to vector<8x128xi32>
    %195 = arith.cmpi slt, %193, %194 : vector<8x128xi32>
    %cst_124 = arith.constant 0.000000e+00 : f32
    %196 = vector.broadcast %cst_124 : f32 to vector<8x128xf32>
    %197 = arith.select %195, %192, %196 : vector<8x128xi1>, vector<8x128xf32>
    %198 = arith.truncf %197 : vector<8x128xf32> to vector<8x128xbf16>
    %c0_125 = arith.constant 0 : index
    %c0_126 = arith.constant 0 : index
    %c0_127 = arith.constant 0 : index
    %199 = vector.load %arg18[%c0_125, %c0_126, %c0_127] : memref<3x128x128xbf16, #tpu.memory_space<vmem>>, vector<1x128x128xbf16>
    %200 = vector.shape_cast %199 : vector<1x128x128xbf16> to vector<128x128xbf16>
    %cst_128 = arith.constant dense<0.000000e+00> : vector<8x128xf32>
    %201 = tpu.matmul %190, %200, %cst_128 {dimension_numbers = #tpu.dot_dimension_numbers<[1], [0], [0], [1], [0, 0, 1, 1], [], []>} : vector<8x128xbf16>, vector<128x128xbf16>, vector<8x128xf32> -> vector<8x128xf32>
    %c1_129 = arith.constant 1 : index
    %c0_130 = arith.constant 0 : index
    %c0_131 = arith.constant 0 : index
    %202 = vector.load %arg18[%c1_129, %c0_130, %c0_131] : memref<3x128x128xbf16, #tpu.memory_space<vmem>>, vector<1x128x128xbf16>
    %203 = vector.shape_cast %202 : vector<1x128x128xbf16> to vector<128x128xbf16>
    %cst_132 = arith.constant dense<0.000000e+00> : vector<8x128xf32>
    %204 = tpu.matmul %191, %203, %cst_132 {dimension_numbers = #tpu.dot_dimension_numbers<[1], [0], [0], [1], [0, 0, 1, 1], [], []>} : vector<8x128xbf16>, vector<128x128xbf16>, vector<8x128xf32> -> vector<8x128xf32>
    %205 = arith.addf %201, %204 : vector<8x128xf32>
    %c2_133 = arith.constant 2 : index
    %c0_134 = arith.constant 0 : index
    %c0_135 = arith.constant 0 : index
    %206 = vector.load %arg18[%c2_133, %c0_134, %c0_135] : memref<3x128x128xbf16, #tpu.memory_space<vmem>>, vector<1x128x128xbf16>
    %207 = vector.shape_cast %206 : vector<1x128x128xbf16> to vector<128x128xbf16>
    %cst_136 = arith.constant dense<0.000000e+00> : vector<8x128xf32>
    %208 = tpu.matmul %198, %207, %cst_136 {dimension_numbers = #tpu.dot_dimension_numbers<[1], [0], [0], [1], [0, 0, 1, 1], [], []>} : vector<8x128xbf16>, vector<128x128xbf16>, vector<8x128xf32> -> vector<8x128xf32>
    %209 = arith.addf %205, %208 : vector<8x128xf32>
    %c0_137 = arith.constant 0 : index
    %c0_138 = arith.constant 0 : index
    %210 = vector.load %arg19[%c0_137, %c0_138] : memref<1x128xf32, #tpu.memory_space<vmem>>, vector<1x128xf32>
    %211 = vector.broadcast %210 : vector<1x128xf32> to vector<8x128xf32>
    %212 = arith.addf %209, %211 : vector<8x128xf32>
    %c0_139 = arith.constant 0 : index
    %c0_140 = arith.constant 0 : index
    %213 = vector.load %arg20[%c0_139, %c0_140] : memref<128x128xbf16, #tpu.memory_space<vmem>>, vector<128x128xbf16>
    %cst_141 = arith.constant dense<0.000000e+00> : vector<8x128xf32>
    %214 = tpu.matmul %167, %213, %cst_141 {dimension_numbers = #tpu.dot_dimension_numbers<[1], [0], [0], [1], [0, 0, 1, 1], [], []>} : vector<8x128xbf16>, vector<128x128xbf16>, vector<8x128xf32> -> vector<8x128xf32>
    %c0_142 = arith.constant 0 : index
    %c0_143 = arith.constant 0 : index
    %215 = vector.load %arg21[%c0_142, %c0_143] : memref<1x128xf32, #tpu.memory_space<vmem>>, vector<1x128xf32>
    %216 = vector.broadcast %215 : vector<1x128xf32> to vector<8x128xf32>
    %217 = arith.addf %214, %216 : vector<8x128xf32>
    %218 = arith.addf %212, %217 : vector<8x128xf32>
    %cst_144 = arith.constant 0.000000e+00 : f32
    %219 = vector.broadcast %cst_144 : f32 to vector<8x128xf32>
    %220 = arith.maximumf %218, %219 : vector<8x128xf32>
    %221 = arith.truncf %220 : vector<8x128xf32> to vector<8x128xbf16>
    %c0_145 = arith.constant 0 : index
    %c0_146 = arith.constant 0 : index
    %222 = vector.load %arg22[%c0_145, %c0_146] : memref<128x128xbf16, #tpu.memory_space<vmem>>, vector<128x128xbf16>
    %cst_147 = arith.constant dense<0.000000e+00> : vector<8x128xf32>
    %223 = tpu.matmul %221, %222, %cst_147 {dimension_numbers = #tpu.dot_dimension_numbers<[1], [0], [0], [1], [0, 0, 1, 1], [], []>} : vector<8x128xbf16>, vector<128x128xbf16>, vector<8x128xf32> -> vector<8x128xf32>
    %cst_148 = arith.constant dense<0.000000e+00> : vector<128xf32>
    %224 = vector.multi_reduction <add>, %223, %cst_148 [0] : vector<8x128xf32> to vector<128xf32>
    %225 = vector.shape_cast %224 : vector<128xf32> to vector<1x128xf32>
    %cst_149 = arith.constant 8.000000e+00 : f32
    %226 = vector.broadcast %cst_149 : f32 to vector<1x128xf32>
    %227 = arith.divf %225, %226 : vector<1x128xf32>
    %c0_150 = arith.constant 0 : index
    %c0_151 = arith.constant 0 : index
    %228 = vector.load %arg23[%c0_150, %c0_151] : memref<1x128xf32, #tpu.memory_space<vmem>>, vector<1x128xf32>
    %229 = arith.addf %227, %228 : vector<1x128xf32>
    %230 = vector.shape_cast %229 : vector<1x128xf32> to vector<1x128xf32>
    %231 = vector.broadcast %230 : vector<1x128xf32> to vector<8x128xf32>
    %c0_152 = arith.constant 0 : index
    %c0_153 = arith.constant 0 : index
    %232 = vector.load %arg24[%c0_152, %c0_153] : memref<8x128xf32, #tpu.memory_space<vmem>>, vector<8x128xf32>
    tpu.vector_store %arg24[%c0_152, %c0_153], %231 {strides = array<i32>} : memref<8x128xf32, #tpu.memory_space<vmem>>, vector<8x128xf32>,
    return
  }
  func.func @transform_0(%arg0: i32) -> (i32, i32) {
    %c0_i32 = arith.constant 0 : i32
    %c0_i32_0 = arith.constant 0 : i32
    return %arg0, %c0_i32 : i32, i32
  }
  func.func @transform_1(%arg0: i32) -> (i32, i32, i32) {
    %c0_i32 = arith.constant 0 : i32
    %c0_i32_0 = arith.constant 0 : i32
    %c0_i32_1 = arith.constant 0 : i32
    %c0_i32_2 = arith.constant 0 : i32
    return %c0_i32, %c0_i32_0, %c0_i32_1 : i32, i32, i32
  }
  func.func @transform_2(%arg0: i32) -> (i32, i32) {
    %c0_i32 = arith.constant 0 : i32
    %c0_i32_0 = arith.constant 0 : i32
    %c0_i32_1 = arith.constant 0 : i32
    return %c0_i32, %c0_i32_0 : i32, i32
  }
  func.func @transform_3(%arg0: i32) -> (i32, i32, i32) {
    %c0_i32 = arith.constant 0 : i32
    %c0_i32_0 = arith.constant 0 : i32
    %c0_i32_1 = arith.constant 0 : i32
    %c0_i32_2 = arith.constant 0 : i32
    return %c0_i32, %c0_i32_0, %c0_i32_1 : i32, i32, i32
  }
  func.func @transform_4(%arg0: i32) -> (i32, i32) {
    %c0_i32 = arith.constant 0 : i32
    %c0_i32_0 = arith.constant 0 : i32
    %c0_i32_1 = arith.constant 0 : i32
    return %c0_i32, %c0_i32_0 : i32, i32
  }
  func.func @transform_5(%arg0: i32) -> (i32, i32, i32) {
    %c0_i32 = arith.constant 0 : i32
    %c0_i32_0 = arith.constant 0 : i32
    %c0_i32_1 = arith.constant 0 : i32
    %c0_i32_2 = arith.constant 0 : i32
    return %c0_i32, %c0_i32_0, %c0_i32_1 : i32, i32, i32
  }
  func.func @transform_6(%arg0: i32) -> (i32, i32) {
    %c0_i32 = arith.constant 0 : i32
    %c0_i32_0 = arith.constant 0 : i32
    %c0_i32_1 = arith.constant 0 : i32
    return %c0_i32, %c0_i32_0 : i32, i32
  }
  func.func @transform_7(%arg0: i32) -> (i32, i32) {
    %c0_i32 = arith.constant 0 : i32
    %c0_i32_0 = arith.constant 0 : i32
    %c0_i32_1 = arith.constant 0 : i32
    return %c0_i32, %c0_i32_0 : i32, i32
  }
  func.func @transform_8(%arg0: i32) -> (i32, i32, i32) {
    %c0_i32 = arith.constant 0 : i32
    %c0_i32_0 = arith.constant 0 : i32
    %c0_i32_1 = arith.constant 0 : i32
    %c0_i32_2 = arith.constant 0 : i32
    return %c0_i32, %c0_i32_0, %c0_i32_1 : i32, i32, i32
  }
  func.func @transform_9(%arg0: i32) -> (i32, i32) {
    %c0_i32 = arith.constant 0 : i32
    %c0_i32_0 = arith.constant 0 : i32
    %c0_i32_1 = arith.constant 0 : i32
    return %c0_i32, %c0_i32_0 : i32, i32
  }
  func.func @transform_10(%arg0: i32) -> (i32, i32, i32) {
    %c0_i32 = arith.constant 0 : i32
    %c0_i32_0 = arith.constant 0 : i32
    %c0_i32_1 = arith.constant 0 : i32
    %c0_i32_2 = arith.constant 0 : i32
    return %c0_i32, %c0_i32_0, %c0_i32_1 : i32, i32, i32
  }
  func.func @transform_11(%arg0: i32) -> (i32, i32) {
    %c0_i32 = arith.constant 0 : i32
    %c0_i32_0 = arith.constant 0 : i32
    %c0_i32_1 = arith.constant 0 : i32
    return %c0_i32, %c0_i32_0 : i32, i32
  }
  func.func @transform_12(%arg0: i32) -> (i32, i32) {
    %c0_i32 = arith.constant 0 : i32
    %c0_i32_0 = arith.constant 0 : i32
    %c0_i32_1 = arith.constant 0 : i32
    return %c0_i32, %c0_i32_0 : i32, i32
  }
  func.func @transform_13(%arg0: i32) -> (i32, i32) {
    %c0_i32 = arith.constant 0 : i32
    %c0_i32_0 = arith.constant 0 : i32
    %c0_i32_1 = arith.constant 0 : i32
    return %c0_i32, %c0_i32_0 : i32, i32
  }
  func.func @transform_14(%arg0: i32) -> (i32, i32) {
    %c0_i32 = arith.constant 0 : i32
    %c0_i32_0 = arith.constant 0 : i32
    %c0_i32_1 = arith.constant 0 : i32
    return %c0_i32, %c0_i32_0 : i32, i32
  }
  func.func @transform_15(%arg0: i32) -> (i32, i32, i32) {
    %c0_i32 = arith.constant 0 : i32
    %c0_i32_0 = arith.constant 0 : i32
    %c0_i32_1 = arith.constant 0 : i32
    %c0_i32_2 = arith.constant 0 : i32
    return %c0_i32, %c0_i32_0, %c0_i32_1 : i32, i32, i32
  }
  func.func @transform_16(%arg0: i32) -> (i32, i32) {
    %c0_i32 = arith.constant 0 : i32
    %c0_i32_0 = arith.constant 0 : i32
    %c0_i32_1 = arith.constant 0 : i32
    return %c0_i32, %c0_i32_0 : i32, i32
  }
  func.func @transform_17(%arg0: i32) -> (i32, i32, i32) {
    %c0_i32 = arith.constant 0 : i32
    %c0_i32_0 = arith.constant 0 : i32
    %c0_i32_1 = arith.constant 0 : i32
    %c0_i32_2 = arith.constant 0 : i32
    return %c0_i32, %c0_i32_0, %c0_i32_1 : i32, i32, i32
  }
  func.func @transform_18(%arg0: i32) -> (i32, i32) {
    %c0_i32 = arith.constant 0 : i32
    %c0_i32_0 = arith.constant 0 : i32
    %c0_i32_1 = arith.constant 0 : i32
    return %c0_i32, %c0_i32_0 : i32, i32
  }
  func.func @transform_19(%arg0: i32) -> (i32, i32) {
    %c0_i32 = arith.constant 0 : i32
    %c0_i32_0 = arith.constant 0 : i32
    %c0_i32_1 = arith.constant 0 : i32
    return %c0_i32, %c0_i32_0 : i32, i32
  }
  func.func @transform_20(%arg0: i32) -> (i32, i32) {
    %c0_i32 = arith.constant 0 : i32
    %c0_i32_0 = arith.constant 0 : i32
    %c0_i32_1 = arith.constant 0 : i32
    return %c0_i32, %c0_i32_0 : i32, i32
  }
  func.func @transform_21(%arg0: i32) -> (i32, i32) {
    %c0_i32 = arith.constant 0 : i32
    %c0_i32_0 = arith.constant 0 : i32
    %c0_i32_1 = arith.constant 0 : i32
    return %c0_i32, %c0_i32_0 : i32, i32
  }
  func.func @transform_22(%arg0: i32) -> (i32, i32) {
    %c0_i32 = arith.constant 0 : i32
    %c0_i32_0 = arith.constant 0 : i32
    %c0_i32_1 = arith.constant 0 : i32
    return %c0_i32, %c0_i32_0 : i32, i32
  }
  func.func @transform_23(%arg0: i32) -> (i32, i32) {
    %c0_i32 = arith.constant 0 : i32
    %c0_i32_0 = arith.constant 0 : i32
    return %arg0, %c0_i32 : i32, i32
  }
}

</mosaic_0001>

<bundles_post_ra>
// kernel: _lambda_.1
= control target key start
LH: loop header
LB: loop body
LE: loop exit
PB: predicated region body
PF: predicated region fallthrough
CT: control target
= control target key end

     0   :  { %s6778_s0 = inlined_call_operand.vmem [shape: f32[64,128], index: 0, kind: input, shape index: {}]   ;;  %s6779_s1 = inlined_call_operand.vmem [shape: bf16[3,128,128], index: 1, kind: input, shape index: {}]   ;;  %s6780_s2 = inlined_call_operand.vmem [shape: f32[1,128], index: 2, kind: input, shape index: {}, may-alias: {2,4,6,9,11,13,16,18,20}]   ;;  %s6781_s3 = inlined_call_operand.vmem [shape: bf16[3,128,128], index: 3, kind: input, shape index: {}]   ;;  %s6782_s4 = inlined_call_operand.vmem [shape: f32[1,128], index: 4, kind: input, shape index: {}, may-alias: {2,4,6,9,11,13,16,18,20}]   ;;  %s6783_s5 = inlined_call_operand.vmem [shape: bf16[3,128,128], index: 5, kind: input, shape index: {}]   ;;  %s6784_s6 = inlined_call_operand.vmem [shape: f32[1,128], index: 6, kind: input, shape index: {}, may-alias: {2,4,6,9,11,13,16,18,20}]   ;;  %s6785_s7 = inlined_call_operand.hbm [shape: f32[64,32], index: 7, kind: input, shape index: {}]   ;;  %s6786_s8 = inlined_call_operand.vmem [shape: bf16[3,128,128], index: 8, kind: input, shape index: {}]   ;;  %s6787_s9 = inlined_call_operand.vmem [shape: f32[1,128], index: 9, kind: input, shape index: {}, may-alias: {2,4,6,9,11,13,16,18,20}]   ;;  %s6788_s10 = inlined_call_operand.vmem [shape: bf16[3,128,128], index: 10, kind: input, shape index: {}]   ;;  %s6789_s11 = inlined_call_operand.vmem [shape: f32[1,128], index: 11, kind: input, shape index: {}, may-alias: {2,4,6,9,11,13,16,18,20}]   ;;  %s6790_s12 = inlined_call_operand.vmem [shape: bf16[128,128], index: 12, kind: input, shape index: {}]   ;;  %s6791_s13 = inlined_call_operand.vmem [shape: f32[1,128], index: 13, kind: input, shape index: {}, may-alias: {2,4,6,9,11,13,16,18,20}]   ;;  %s6792_s14 = inlined_call_operand.hbm [shape: f32[32,16], index: 14, kind: input, shape index: {}]   ;;  %s6793_s15 = inlined_call_operand.vmem [shape: bf16[3,128,128], index: 15, kind: input, shape index: {}]   ;;  %s6794_s16 = inlined_call_operand.vmem [shape: f32[1,128], index: 16, kind: input, shape index: {}, may-alias: {2,4,6,9,11,13,16,18,20}]   ;;  %s6795_s17 = inlined_call_operand.vmem [shape: bf16[3,128,128], index: 17, kind: input, shape index: {}]   ;;  %s6796_s18 = inlined_call_operand.vmem [shape: f32[1,128], index: 18, kind: input, shape index: {}, may-alias: {2,4,6,9,11,13,16,18,20}]   ;;  %s6797_s19 = inlined_call_operand.vmem [shape: bf16[128,128], index: 19, kind: input, shape index: {}]   ;;  %s6798_s20 = inlined_call_operand.vmem [shape: f32[1,128], index: 20, kind: input, shape index: {}, may-alias: {2,4,6,9,11,13,16,18,20}]   ;;  %s6799_s21 = inlined_call_operand.hbm [shape: bf16[128,128], index: 21, kind: input, shape index: {}]   ;;  %s6800_s22 = inlined_call_operand.vmem [shape: f32[1,128], index: 22, kind: input, shape index: {}]   ;;  %s6801_s23 = inlined_call_operand.vmem [shape: f32[16,128], index: 23, kind: output, shape index: {}]  }
   0x1   :  { %6808 = sst [smem:[#allocation10_spill]] %s6778_s0 }
   0x2   :  { %6809 = sst [smem:[#allocation11_spill]] %s6779_s1 }
   0x3   :  { %6810 = sst [smem:[#allocation12_spill]] %s6780_s2 }
   0x4   :  { %6811 = sst [smem:[#allocation13_spill]] %s6781_s3 }
   0x5   :  { %6812 = sst [smem:[#allocation14_spill]] %s6782_s4 }
   0x6   :  { %6813 = sst [smem:[#allocation15_spill]] %s6783_s5 }
   0x7   :  { %6814 = sst [smem:[#allocation16_spill]] %s6784_s6 }
   0x8   :  { %6815 = sst [smem:[#allocation17_spill]] %s6785_s7 }
   0x9   :  { %6816 = sst [smem:[#allocation18_spill]] %s6796_s18 }
   0xa   :  { %6817 = sst [smem:[#allocation19_spill]] %s6797_s19 }
   0xb   :  { %6818 = sst [smem:[#allocation20_spill]] %s6798_s20 }
   0xc   :  { %6819 = sst [smem:[#allocation21_spill]] %s6800_s22 }
   0xd   :  { %6820 = sst [smem:[#allocation22_spill]] %s6801_s23 }
   0xe   :  { %28 = vsyncpa [#allocation3], 0 }
   0xf   :  { %29 = vsyncpa [#allocation5], 0  ;;  %s5729_s4 = smov 0  }
  0x10 LB: > { %6821 = sst [smem:[#allocation9_spill]] %s5597_s4  ;;  %s5735_s30 = sadd.s32 4294967295, %s5597_s4   ;;  %s5597_s4 = sphi %s5729_s4, %s35_s4  }
  0x11   : > { %p3961_p0 = scmp.ge.s32.totalorder %s5597_s4, 1  ;;  %p554_p1 = scmp.lt.s32.totalorder %s5597_s4, 3 }
  0x12   : > { %p5283_p2 = scmp.eq.s32.totalorder %s5735_s30, 0  ;;  %s5599_s25 = smov [#allocation4]  }
  0x13   : > { %p5740_p3 = pnand %p3961_p0, %p554_p1  ;;  %s615_s5 = sshll.u32 %s5599_s25, 4  ;;  %s5744_s5 = int_to_ptr.vmem [resolvable:$true] %s615_s5 }
  0x14   : > { %s5600_s1 = smov [#allocation2]   ;;  %s5601_s6 = smov [#allocation6]  }
  0x15   : > { %p5273_p4 = pneg %p5740_p3  ;;  %s584_s26 = sshll.u32 %s5600_s1, 4  ;;  %s5748_s26 = int_to_ptr.vmem [resolvable:$true] %s584_s26 }
  0x16   : > { %s646_s27 = sshll.u32 %s5601_s6, 4  ;;  %s5499_s29 = scalar_lea.hbm %s6792_s14, 512  ;;  %s5756_s27 = int_to_ptr.vmem [resolvable:$true] %s646_s27 }
  0x17   : > { %p5752_p5 = pnand %p5283_p2, %p5273_p4  ;;  %p5500_p6 = scmp.ne.s32.totalorder %s6792_s14, %s5499_s29 }
  0x18   : > { %p5506_p10 = scmp.lt.u32.totalorder %s5499_s29, %s6792_s14 }
  0x19   : > { %p5766_p7 = pneg %p5752_p5 }
  0x1b   : > { %p5502_p8 = pnand %p5766_p7, %p5500_p6 }
  0x1d   : > { %p5503_p9 = pneg %p5502_p8 }
  0x1f   : > { %p5508_p11 = pnand %p5506_p10, %p5503_p9 }
  0x21   : > { %5511 = shalt.err (!%p5508_p11)
}
  0x22   : > { %s5512_s7 = scalar_lea.vmem %s5744_s5, 512  ;;  %p5520_p1 = scmp.lt.s32.totalorder %s5744_s5, %s5744_s5 }
  0x23   : > { %p5513_p12 = scmp.ne.s32.totalorder %s5744_s5, %s5512_s7  ;;  %p5521_p4 = scmp.lt.s32.totalorder %s5512_s7, %s5512_s7 }
  0x25   : > { %p5515_p13 = pnand %p5513_p12, %p5766_p7  ;;  %p5522_p6 = por %p5521_p4, %p5520_p1 }
  0x27   : > { %p5516_p0 = pneg %p5515_p13 }
  0x29   : > { %p5523_p8 = pnand %p5522_p6, %p5516_p0 }
  0x2b   : > { %5526 = shalt.err (!%p5523_p8)
}
  0x2c   : > { %s5602_s28 = smov 128   ;;  %s5603_s29 = smov 8  }
  0x2d   : > { %5279 = dma.hbm_to_vmem [thread:$0]  (!%p5752_p5), %s6792_s14, 512, %s5744_s5, [#allocation5], %s5602_s28, %s5602_s28, %s5603_s29  }
  0x2e   : > { %s6825_s4 = sld [smem:[#allocation17_spill]] }
  0x34   : > { %s6826_s23 = smov %s6825_s4  ;;  %s5527_s22 = scalar_lea.hbm %s6825_s4, 1024 }
  0x35   : > { %p5528_p9 = scmp.ne.s32.totalorder %s6826_s23, %s5527_s22  ;;  %p5534_p12 = scmp.lt.u32.totalorder %s5527_s22, %s6826_s23 }
  0x37   : > { %p5530_p10 = pnand %p5528_p9, %p5766_p7 }
  0x39   : > { %p5531_p11 = pneg %p5530_p10 }
  0x3b   : > { %p5536_p13 = pnand %p5534_p12, %p5531_p11 }
  0x3d   : > { %5539 = shalt.err (!%p5536_p13)
}
  0x3e   : > { %s5540_s5 = scalar_lea.vmem %s5748_s26, 1024  ;;  %p5548_p6 = scmp.lt.s32.totalorder %s5748_s26, %s5748_s26 }
  0x3f   : > { %p5541_p0 = scmp.ne.s32.totalorder %s5748_s26, %s5540_s5  ;;  %p5549_p8 = scmp.lt.s32.totalorder %s5540_s5, %s5540_s5 }
  0x41   : > { %p5543_p1 = pnand %p5541_p0, %p5766_p7  ;;  %p5550_p9 = por %p5549_p8, %p5548_p6 }
  0x43   : > { %p5544_p4 = pneg %p5543_p1 }
  0x45   : > { %p5551_p10 = pnand %p5550_p9, %p5544_p4 }
  0x47   : > { %5554 = shalt.err (!%p5551_p10)
}
  0x48   : > { %5276 = dma.hbm_to_vmem [thread:$0]  (!%p5752_p5), %s6826_s23, 1024, %s5748_s26, [#allocation3], %s5602_s28, %s5602_s28, %s5603_s29  }
  0x49   : > { %s5555_s4 = scalar_lea.hbm %s6799_s21, 1024 }
  0x4a   : > { %p5556_p11 = scmp.ne.s32.totalorder %s6799_s21, %s5555_s4  ;;  %p5562_p0 = scmp.lt.u32.totalorder %s5555_s4, %s6799_s21 }
  0x4c   : > { %p5558_p12 = pnand %p5556_p11, %p5766_p7 }
  0x4e   : > { %p5559_p13 = pneg %p5558_p12 }
  0x50   : > { %p5564_p1 = pnand %p5562_p0, %p5559_p13 }
  0x52   : > { %5567 = shalt.err (!%p5564_p1)
}
  0x53   : > { %s5568_s26 = scalar_lea.vmem %s5756_s27, 1024  ;;  %p5576_p9 = scmp.lt.s32.totalorder %s5756_s27, %s5756_s27 }
  0x54   : > { %p5569_p4 = scmp.ne.s32.totalorder %s5756_s27, %s5568_s26  ;;  %p5577_p10 = scmp.lt.s32.totalorder %s5568_s26, %s5568_s26 }
  0x56   : > { %p5571_p6 = pnand %p5569_p4, %p5766_p7  ;;  %p5578_p11 = por %p5577_p10, %p5576_p9 }
  0x58   : > { %p5572_p8 = pneg %p5571_p6 }
  0x5a   : > { %p5579_p12 = pnand %p5578_p11, %p5572_p8 }
  0x5c   : > { %5582 = shalt.err (!%p5579_p12)
}
  0x5d   : > { %s5604_s28 = smov 64   ;;  %s5605_s29 = smov 4  }
  0x5e   : > { %5282 = dma.hbm_to_vmem [thread:$0]  (!%p5752_p5), %s6799_s21, 1024, %s5756_s27, [#allocation5], %s5604_s28, %s5604_s28, %s5605_s29  }
  0x5f   : > { %674 = sbr.rel (%p5740_p3) target bundleno = 2852 (0xb24), region = 112 }
  0x66   : > { %5588 = dma.done.wait (%p5283_p2), [#allocation3], 1024  }
  0x67   : > { %5590 = vsyncadd (%p5283_p2), [#allocation3], 4294966272 }
  0x68   : > { %5592 = dma.done.wait (%p5283_p2), [#allocation5], 1536  }
  0x69   : > { %5594 = vsyncadd (%p5283_p2), [#allocation5], 4294965760  ;;  %s3970_s2 = sshll.u32 %s5735_s30, 2  ;;  %s6827_s24 = sld [smem:[#allocation11_spill]]  ;;  %v764_v9 = vlaneseq  ;;  %vm5606_vm2 = vmmov 1   ;;  %vm1957_vm7 = vcmask 261120  }
  0x6a   : > { %p746_p7 = scmp.lt.s32.totalorder %s3970_s2, 7  ;;  %s6828_s1 = sld [smem:[#allocation10_spill]]  ;;  %v5381_v56 = vld [vmem:[%s6786_s8 + $0x50] sm:$0xff]   ;;  %vm5608_vm8 = vmmov 0   ;;  %v5422_v24 = vld [vmem:[%s6788_s10 + $0x98] sm:$0xff]   ;;  %vm2886_vm11 = vcmask 130048  }
  0x6b   : > { %v5874_v11 = vshrl.u32 %v764_v9, 7  ;;  %s6829_s4 = sld [smem:[#allocation13_spill]]  ;;  %s6836_s26 = sld [smem:[#allocation15_spill]] }
  0x6c   : > { %s6846_s2 = smov (!%p746_p7, %s3970_s2), 7  ;;  %s6837_s5 = sld [smem:[#allocation14_spill]] }
  0x6d   : > { %s3971_s20 = sshll.u32 %s6846_s2, 3  ;;  %vm766_vm0 = vcmp.lt.s32.totalorder %v5874_v11, 1  ;;  %vm774_vm1 = vcmp.ge.s32.totalorder %v5874_v11, 1  ;;  %v5920_v29 = vadd.s32 24, %v5874_v11  ;;  %vm790_vm4 = vcmp.lt.s32.totalorder %v5874_v11, 7  ;;  %s6839_s28 = sld [smem:[#allocation19_spill]] }
  0x6e   : > { %vm5908_vm3 = vmpackc.low %vm5606_vm2, %vm774_vm1  ;;  %s6841_s25 = sld [smem:[#allocation20_spill]]  ;;  %p751_p2 = scmp.lt.s32.totalorder %s5735_s30, 1 }
  0x6f   : > { %v5307_v0 = vld [vmem:[%s6827_s24 + $0x40] sm:$0xff]   ;;  %v5308_v1 = vld [vmem:[%s6827_s24 + $0x48] sm:$0xff]   ;;  %v5309_v2 = vld [vmem:[%s6827_s24 + $0x50] sm:$0xff]   ;;  %vm798_vm5 = vcmp.lt.s32.totalorder %v5920_v29, 31 }
  0x70   : > { %4685 = vmatprep.subr.bf16.mxu0 %v5307_v0  ;;  %s749_s6 = scalar_lea.vmem %s6828_s1, %s3971_s20  ;;  %v5310_v3 = vld [vmem:[%s6827_s24 + $0x58] sm:$0xff]   ;;  %v5311_v7 = vld [vmem:[%s6827_s24 + $0x60] sm:$0xff]   ;;  %v5312_v8 = vld [vmem:[%s6827_s24 + $0x68] sm:$0xff]   ;;  %s6848_s30 = smov (!%p751_p2, %s5735_s30), 1 }
  0x71   : > { %4686 = vmatpush3.bf16.msra.mxu0 %v5307_v0  ;;  %v5859_v4 = vld [vmem:[%s749_s6] sm:$0xff]  ;;  %v5861_v5 = vld [vmem:[%s749_s6 + $0x8] sm:$0xff]  ;;  %v5313_v10 = vld [vmem:[%s6827_s24 + $0x70] sm:$0xff]   ;;  %s6830_s3 = smov %s6829_s4  ;;  %s6842_s20 = sld [smem:[#allocation21_spill]] }
  0x72   : > { %4687 = vmatprep.subr.bf16.mxu0 %v5308_v1  ;;  %v784_v6 = vpack.c.bf16 %v5861_v5, %v5859_v4  ;;  %v5314_v12 = vld [vmem:[%s6827_s24 + $0x78] sm:$0xff]   ;;  %v760_v13 = vrot.slane %v5859_v4, 7  ;;  %v761_v15 = vrot.slane %v5861_v5, 7  ;;  %v5885_v17 = vld [vmem:[%s749_s6 + $0x10] sm:$0xff]  ;;  %v5332_v18 = vld [vmem:[%s6829_s4] sm:$0xff]   ;;  %v786_v28 = vrot.slane %v5859_v4, 1 }
  0x73   : > { %v5880_v14 = vld [vmem:[%s749_s6 + $0x18] sm:$0xff]  ;;  %v5315_v19 = vld [vmem:[%s6827_s24] sm:$0xff]   ;;  %4765 = vmatprep.subr.bf16.mxu1 %v5332_v18  ;;  %v5334_v22 = vld [vmem:[%s6830_s3 + $0x8] sm:$0xff]   ;;  %v787_v30 = vrot.slane %v5861_v5, 1  ;;  %v762_v31 = vrot.slane %v5885_v17, 7  ;;  %v788_v32 = vrot.slane %v5885_v17, 1 }
  0x74   : > { %4701 = vmatprep.mubr.bf16.mxu0 %v784_v6  ;;  %v763_v16 = vrot.slane %v5880_v14, 7  ;;  %v769_v20 = vsel %vm766_vm0, %v760_v13, %v761_v15  ;;  %v785_v23 = vpack.c.bf16 %v5880_v14, %v5885_v17  ;;  %4766 = vmatpush3.bf16.msra.mxu1 %v5332_v18  ;;  %v5316_v25 = vld [vmem:[%s6827_s24 + $0x8] sm:$0xff]   ;;  %v5336_v27 = vld [vmem:[%s6830_s3 + $0x10] sm:$0xff]   ;;  %v5338_v33 = vld [vmem:[%s6830_s3 + $0x18] sm:$0xff]   ;;  %v789_v34 = vrot.slane %v5880_v14, 1  ;;  %s6835_s6 = sld [smem:[#allocation12_spill]] }
  0x75   : > { %4688 = vmatpush3.bf16.msra.mxu0 %v5308_v1  ;;  %4767 = vmatprep.subr.bf16.mxu1 %v5334_v22  ;;  %v5317_v35 = vld [vmem:[%s6827_s24 + $0x10] sm:$0xff]   ;;  %v5340_v36 = vld [vmem:[%s6830_s3 + $0x20] sm:$0xff]   ;;  %v5318_v37 = vld [vmem:[%s6827_s24 + $0x18] sm:$0xff]   ;;  %v768_v44 = vsel %vm766_vm0, %v761_v15, %v762_v31  ;;  %v792_v45 = vsel %vm790_vm4, %v787_v30, %v788_v32  ;;  %v793_v46 = vsel %vm790_vm4, %v786_v28, %v787_v30  ;;  %s3972_s22 = sshll.u32 %s6848_s30, 3  ;;  %s6843_s1 = sld [smem:[#allocation22_spill]] }
  0x76   : > { %4689 = vmatprep.subr.bf16.mxu0 %v5309_v2  ;;  %v770_v21 = vsel %vm766_vm0, %v763_v16, %v760_v13  ;;  %v5319_v38 = vld [vmem:[%s6827_s24 + $0x20] sm:$0xff]   ;;  %v5320_v39 = vld [vmem:[%s6827_s24 + $0x28] sm:$0xff]   ;;  %v5321_v40 = vld [vmem:[%s6827_s24 + $0x30] sm:$0xff]   ;;  %v767_v43 = vsel %vm766_vm0, %v762_v31, %v763_v16  ;;  %v803_v49 = vpack.c.bf16 %v792_v45, %v793_v46  ;;  %v791_v58 = vsel %vm790_vm4, %v788_v32, %v789_v34 }
  0x77   : > { %v4006_v26 = vpack.c.bf16 %v769_v20, %v770_v21  ;;  %v5322_v41 = vld [vmem:[%s6827_s24 + $0x38] sm:$0xff]   ;;  %v5323_v42 = vld [vmem:[%s6827_s24 + $0x80] sm:$0xff]   ;;  %v783_v47 = vpack.c.bf16 %v767_v43, %v768_v44  ;;  %v5324_v48 = vld [vmem:[%s6827_s24 + $0x88] sm:$0xff]   ;;  %v794_v59 = vsel %vm790_vm4, %v789_v34, %v786_v28 }
  0x78   : > { %4768 = vmatpush3.bf16.msra.mxu1 %v5334_v22  ;;  %v5325_v50 = vld [vmem:[%s6827_s24 + $0x90] sm:$0xff]   ;;  %v5326_v51 = vld [vmem:[%s6827_s24 + $0x98] sm:$0xff]   ;;  %v5327_v52 = vld [vmem:[%s6827_s24 + $0xa0] sm:$0xff]   ;;  %v4033_v60 = vpack.c.bf16 %v794_v59, %v791_v58 }
  0x79   : > { %4690 = vmatpush3.bf16.msra.mxu0 %v5309_v2  ;;  %4769 = vmatprep.subr.bf16.mxu1 %v5336_v27  ;;  %v5328_v53 = vld [vmem:[%s6827_s24 + $0xa8] sm:$0xff]   ;;  %v5329_v54 = vld [vmem:[%s6827_s24 + $0xb0] sm:$0xff]   ;;  %v5330_v55 = vld [vmem:[%s6827_s24 + $0xb8] sm:$0xff]  }
  0x7a   : > { %4691 = vmatprep.subr.bf16.mxu0 %v5310_v3  ;;  %vm5993_vm6 = vmpackc.low %vm798_vm5, %vm5606_vm2  ;;  %v5331_v57 = vld [vmem:[%s6830_s3 + $0x40] sm:$0xff]   ;;  %v5333_v61 = vld [vmem:[%s6830_s3 + $0x48] sm:$0xff]  }
  0x7b   : > { %v5335_v62 = vld [vmem:[%s6830_s3 + $0x50] sm:$0xff]   ;;  %v5337_v63 = vld [vmem:[%s6830_s3 + $0x58] sm:$0xff]   ;;  %v5339_v0 = vld [vmem:[%s6830_s3 + $0x60] sm:$0xff]  }
  0x7c   : > { %4770 = vmatpush3.bf16.msra.mxu1 %v5336_v27  ;;  %v5341_v1 = vld [vmem:[%s6830_s3 + $0x68] sm:$0xff]   ;;  %v5344_v4 = vld [vmem:[%s6830_s3 + $0x30] sm:$0xff]   ;;  %v5345_v5 = vld [vmem:[%s6830_s3 + $0x78] sm:$0xff]  }
  0x7d   : > { %4692 = vmatpush3.bf16.msra.mxu0 %v5310_v3  ;;  %4771 = vmatprep.subr.bf16.mxu1 %v5338_v33  ;;  %v5342_v2 = vld [vmem:[%s6830_s3 + $0x28] sm:$0xff]   ;;  %v5343_v3 = vld [vmem:[%s6830_s3 + $0x70] sm:$0xff]   ;;  %v5346_v6 = vld [vmem:[%s6830_s3 + $0x38] sm:$0xff]  }
  0x7e   : > { %4693 = vmatprep.subr.bf16.mxu0 %v5311_v7  ;;  %v5350_v43 = vld [vmem:[%s6830_s3 + $0x98] sm:$0xff]   ;;  %v5351_v44 = vld [vmem:[%s6830_s3 + $0xa0] sm:$0xff]   ;;  %v5352_v45 = vld [vmem:[%s6830_s3 + $0xa8] sm:$0xff]  }
  0x7f   : > { %v5353_v46 = vld [vmem:[%s6830_s3 + $0xb0] sm:$0xff]   ;;  %v5360_v58 = vld [vmem:[%s6836_s26 + $0x68] sm:$0xff]   ;;  %vm4392_vm12 = vmpackc.low %vm774_vm1, %vm774_vm1 }
  0x80   : > { %4772 = vmatpush3.bf16.msra.mxu1 %v5338_v33  ;;  %v5361_v59 = vld [vmem:[%s6836_s26 + $0x70] sm:$0xff]   ;;  %vm4419_vm13 = vmpackc.low %vm790_vm4, %vm790_vm4 }
  0x81   : > { %4694 = vmatpush3.bf16.msra.mxu0 %v5311_v7  ;;  %4773 = vmatprep.subr.bf16.mxu1 %v5340_v36  ;;  %v5347_v7 = vld [vmem:[%s6830_s3 + $0x80] sm:$0xff]  }
  0x82   : > { %4695 = vmatprep.subr.bf16.mxu0 %v5312_v8 }
  0x84   : > { %4774 = vmatpush3.bf16.msra.mxu1 %v5340_v36 }
  0x85   : > { %4696 = vmatpush3.bf16.msra.mxu0 %v5312_v8  ;;  %4775 = vmatprep.subr.bf16.mxu1 %v5342_v2  ;;  %v4035_v8 = vld [vmem:[%s6835_s6] ss:$0 sm:$0xff]  ;;  %s754_s6 = scalar_lea.vmem %s6843_s1, %s3972_s22 }
  0x86   : > { %4697 = vmatprep.subr.bf16.mxu0 %v5313_v10 }
  0x88   : > { %4776 = vmatpush3.bf16.msra.mxu1 %v5342_v2 }
  0x89   : > { %4698 = vmatpush3.bf16.msra.mxu0 %v5313_v10  ;;  %4777 = vmatprep.subr.bf16.mxu1 %v5344_v4 }
  0x8a   : > { %4699 = vmatprep.subr.bf16.mxu0 %v5314_v12 }
  0x8c   : > { %4778 = vmatpush3.bf16.msra.mxu1 %v5344_v4 }
  0x8d   : > { %4700 = vmatpush3.bf16.msra.mxu0 %v5314_v12  ;;  %4779 = vmatprep.subr.bf16.mxu1 %v5346_v6 }
  0x8e   : > { %4705 = vmatprep.subr.bf16.mxu0 %v5315_v19 }
  0x90   : > { %4702 = vmatmul.mubr.bf16.vlgmr.msra.gmra.mrb[0].mxu0 %v785_v23  ;;  %4780 = vmatpush3.bf16.msra.mxu1 %v5346_v6 }
  0x91   : > { %4706 = vmatpush3.bf16.msra.mxu0 %v5315_v19  ;;  %4721 = vmatprep.mubr.msk.bf16.mxu0 %vm5908_vm3, %v4006_v26 }
  0x92   : > { %4707 = vmatprep.subr.bf16.mxu0 %v5316_v25  ;;  %4785 = vmatprep.subr.bf16.mxu1 %v5347_v7 }
  0x95   : > { %4708 = vmatpush3.bf16.msra.mxu0 %v5316_v25 }
  0x96   : > { %4709 = vmatprep.subr.bf16.mxu0 %v5317_v35 }
  0x99   : > { %4710 = vmatpush3.bf16.msra.mxu0 %v5317_v35 }
  0x9a   : > { %4711 = vmatprep.subr.bf16.mxu0 %v5318_v37 }
  0x9d   : > { %4712 = vmatpush3.bf16.msra.mxu0 %v5318_v37 }
  0x9e   : > { %4713 = vmatprep.subr.bf16.mxu0 %v5319_v38 }
  0xa1   : > { %4714 = vmatpush3.bf16.msra.mxu0 %v5319_v38 }
  0xa2   : > { %4715 = vmatprep.subr.bf16.mxu0 %v5320_v39 }
  0xa5   : > { %4716 = vmatpush3.bf16.msra.mxu0 %v5320_v39 }
  0xa6   : > { %4717 = vmatprep.subr.bf16.mxu0 %v5321_v40 }
  0xa9   : > { %4718 = vmatpush3.bf16.msra.mxu0 %v5321_v40  ;;  %v5348_v40 = vld [vmem:[%s6830_s3 + $0x88] sm:$0xff]  }
  0xaa   : > { %4719 = vmatprep.subr.bf16.mxu0 %v5322_v41 }
  0xad   : > { %4720 = vmatpush3.bf16.msra.mxu0 %v5322_v41 }
  0xae   : > { %4725 = vmatprep.subr.bf16.mxu0 %v5323_v42 }
  0xb0   : > { %4722 = vmatmul.mubr.bf16.vlgmr.msra.gmra.mrb[0].mxu0 %v783_v47  ;;  %v5354_v47 = vld [vmem:[%s6830_s3 + $0xb8] sm:$0xff]  }
  0xb1   : > { %4726 = vmatpush3.bf16.msra.mxu0 %v5323_v42  ;;  %4741 = vmatprep.mubr.bf16.mxu0 %v803_v49  ;;  %v5349_v42 = vld [vmem:[%s6830_s3 + $0x90] sm:$0xff]  }
  0xb2   : > { %4727 = vmatprep.subr.bf16.mxu0 %v5324_v48 }
  0xb5   : > { %4728 = vmatpush3.bf16.msra.mxu0 %v5324_v48 }
  0xb6   : > { %4729 = vmatprep.subr.bf16.mxu0 %v5325_v50 }
  0xb9   : > { %4730 = vmatpush3.bf16.msra.mxu0 %v5325_v50 }
  0xba   : > { %4731 = vmatprep.subr.bf16.mxu0 %v5326_v51 }
  0xbd   : > { %4732 = vmatpush3.bf16.msra.mxu0 %v5326_v51 }
  0xbe   : > { %4733 = vmatprep.subr.bf16.mxu0 %v5327_v52 }
  0xc1   : > { %4734 = vmatpush3.bf16.msra.mxu0 %v5327_v52  ;;  %v5355_v52 = vld [vmem:[%s6836_s26 + $0x40] sm:$0xff]  }
  0xc2   : > { %4735 = vmatprep.subr.bf16.mxu0 %v5328_v53 }
  0xc5   : > { %4736 = vmatpush3.bf16.msra.mxu0 %v5328_v53  ;;  %v5356_v53 = vld [vmem:[%s6836_s26 + $0x48] sm:$0xff]  }
  0xc6   : > { %4737 = vmatprep.subr.bf16.mxu0 %v5329_v54 }
  0xc9   : > { %4738 = vmatpush3.bf16.msra.mxu0 %v5329_v54  ;;  %v5357_v54 = vld [vmem:[%s6836_s26 + $0x50] sm:$0xff]  }
  0xca   : > { %4739 = vmatprep.subr.bf16.mxu0 %v5330_v55 }
  0xcd   : > { %4740 = vmatpush3.bf16.msra.mxu0 %v5330_v55  ;;  %v5358_v55 = vld [vmem:[%s6836_s26 + $0x58] sm:$0xff]  }
  0xce   : > { %4745 = vmatprep.subr.bf16.mxu0 %v5331_v57 }
  0xd0   : > { %4742 = vmatmul.mubr.msk.bf16.vlgmr.msra.gmra.mrb[0].mxu0 %vm5993_vm6, %v4033_v60  ;;  %v5362_v60 = vld [vmem:[%s6836_s26 + $0x78] sm:$0xff]  }
  0xd1   : > { %4746 = vmatpush3.bf16.msra.mxu0 %v5331_v57  ;;  %v5359_v57 = vld [vmem:[%s6836_s26 + $0x60] sm:$0xff]  }
  0xd2   : > { %4747 = vmatprep.subr.bf16.mxu0 %v5333_v61 }
  0xd5   : > { %4748 = vmatpush3.bf16.msra.mxu0 %v5333_v61  ;;  %v5363_v61 = vld [vmem:[%s6836_s26] sm:$0xff]  }
  0xd6   : > { %4749 = vmatprep.subr.bf16.mxu0 %v5335_v62 }
  0xd9   : > { %4750 = vmatpush3.bf16.msra.mxu0 %v5335_v62 }
  0xda   : > { %4751 = vmatprep.subr.bf16.mxu0 %v5337_v63 }
  0xdd   : > { %4752 = vmatpush3.bf16.msra.mxu0 %v5337_v63 }
  0xde   : > { %4753 = vmatprep.subr.bf16.mxu0 %v5339_v0 }
  0xe1   : > { %4754 = vmatpush3.bf16.msra.mxu0 %v5339_v0 }
  0xe2   : > { %4755 = vmatprep.subr.bf16.mxu0 %v5341_v1 }
  0xe5   : > { %4756 = vmatpush3.bf16.msra.mxu0 %v5341_v1 }
  0xe6   : > { %4757 = vmatprep.subr.bf16.mxu0 %v5343_v3 }
  0xe9   : > { %4758 = vmatpush3.bf16.msra.mxu0 %v5343_v3  ;;  %v4098_v3 = vld [vmem:[%s6837_s5] ss:$0 sm:$0xff]  ;;  %s6838_s5 = sld [smem:[#allocation16_spill]] }
  0xea   : > { %4759 = vmatprep.subr.bf16.mxu0 %v5345_v5 }
  0xed   : > { %4760 = vmatpush3.bf16.msra.mxu0 %v5345_v5 }
  0xee   : > { %4805 = vmatprep.subr.bf16.mxu0 %v5355_v52 }
 0x1a3   : > { %v4743_v9 = vpop.f32.mrb[0].mxu0 }
 0x1a4   : > { %v1159_v10 = vadd.f32 %v4743_v9, %v4035_v8  ;;  %v1131_v12 = vpop.f32.mrb[1].mxu0 }
 0x1a5   : > { %v1157_v13 = vadd.f32 %v4035_v8, %v1131_v12  ;;  %v4744_v14 = vpop.f32.mrb[2].mxu0 }
 0x1a6   : > { %v6050_v15 = vmax.f32 %v1159_v10, 0.0  ;;  %v1160_v16 = vadd.f32 %v4744_v14, %v4035_v8  ;;  %v1134_v17 = vpop.f32.mrb[3].mxu0 }
 0x1a7   : > { %v6052_v18 = vmax.f32 %v1157_v13, 0.0  ;;  %v1158_v19 = vadd.f32 %v4035_v8, %v1134_v17 }
 0x1a8   : > { %v6054_v20 = vmax.f32 %v1160_v16, 0.0  ;;  %v1167_v23 = vrot.slane %v6050_v15, 7  ;;  %v1183_v25 = vrot.slane %v6050_v15, 1 }
 0x1a9   : > { %v6056_v21 = vmax.f32 %v1158_v19, 0.0  ;;  %v1165_v22 = vrot.slane %v6052_v18, 7  ;;  %v1181_v27 = vrot.slane %v6052_v18, 1 }
 0x1aa   : > { %v1168_v26 = vrot.slane %v6054_v20, 7  ;;  %v1180_v31 = vpack.c.bf16 %v6054_v20, %v6050_v15  ;;  %v1184_v48 = vrot.slane %v6054_v20, 1 }
 0x1ab   : > { %v1182_v28 = vrot.slane %v6056_v21, 1  ;;  %v1179_v29 = vpack.c.bf16 %v6056_v21, %v6052_v18  ;;  %v1166_v30 = vrot.slane %v6056_v21, 7 }
 0x1ac   : > { %v1172_v32 = vsel %vm766_vm0, %v1168_v26, %v1165_v22  ;;  %v1169_v33 = vsel %vm766_vm0, %v1167_v23, %v1168_v26  ;;  %v1185_v49 = vsel %vm790_vm4, %v1183_v25, %v1184_v48  ;;  %v1188_v50 = vsel %vm790_vm4, %v1184_v48, %v1181_v27  ;;  %v5365_v48 = vld [vmem:[%s6836_s26 + $0x10] sm:$0xff]  }
 0x1ad   : > { %4761 = vmatprep.mubr.bf16.mxu0 %v1179_v29  ;;  %v1171_v34 = vsel %vm766_vm0, %v1165_v22, %v1166_v30  ;;  %v1170_v35 = vsel %vm766_vm0, %v1166_v30, %v1167_v23  ;;  %v1186_v36 = vsel %vm790_vm4, %v1182_v28, %v1183_v25  ;;  %v1187_v37 = vsel %vm790_vm4, %v1181_v27, %v1182_v28 }
 0x1ae   : > { %4762 = vmatmul.mubr.bf16.vlgmr.msra.gmra.mrb[4].mxu0 %v1180_v31  ;;  %v4069_v38 = vpack.c.bf16 %v1171_v34, %v1172_v32  ;;  %v1178_v39 = vpack.c.bf16 %v1169_v33, %v1170_v35  ;;  %v1193_v41 = vpack.c.bf16 %v1186_v36, %v1187_v37  ;;  %v4096_v51 = vpack.c.bf16 %v1188_v50, %v1185_v49  ;;  %v5366_v49 = vld [vmem:[%s6836_s26 + $0x18] sm:$0xff]   ;;  %v5367_v50 = vld [vmem:[%s6836_s26 + $0x20] sm:$0xff]  }
 0x1af   : > { %4806 = vmatpush3.bf16.msra.mxu0 %v5355_v52  ;;  %v5369_v52 = vld [vmem:[%s6836_s26 + $0x30] sm:$0xff]  }
 0x1b0   : > { %4781 = vmatprep.mubr.msk.bf16.mxu1 %vm5908_vm3, %v4069_v38  ;;  %4807 = vmatprep.subr.bf16.mxu0 %v5356_v53  ;;  %v5364_v38 = vld [vmem:[%s6836_s26 + $0x8] sm:$0xff]  }
 0x1b1   : > { %4782 = vmatmul.mubr.bf16.vlgmr.msra.gmra.mrb[0].mxu1 %v1178_v39 }
 0x1b2   : > { %4786 = vmatpush3.bf16.msra.mxu1 %v5347_v7  ;;  %4801 = vmatprep.mubr.bf16.mxu1 %v1193_v41 }
 0x1b3   : > { %4787 = vmatprep.subr.bf16.mxu1 %v5348_v40  ;;  %4808 = vmatpush3.bf16.msra.mxu0 %v5356_v53  ;;  %v5370_v53 = vld [vmem:[%s6836_s26 + $0x38] sm:$0xff]  }
 0x1b4   : > { %4809 = vmatprep.subr.bf16.mxu0 %v5357_v54 }
 0x1b6   : > { %4788 = vmatpush3.bf16.msra.mxu1 %v5348_v40 }
 0x1b7   : > { %4789 = vmatprep.subr.bf16.mxu1 %v5349_v42  ;;  %4810 = vmatpush3.bf16.msra.mxu0 %v5357_v54  ;;  %v5371_v54 = vld [vmem:[%s6836_s26 + $0x80] sm:$0xff]  }
 0x1b8   : > { %4811 = vmatprep.subr.bf16.mxu0 %v5358_v55 }
 0x1ba   : > { %4790 = vmatpush3.bf16.msra.mxu1 %v5349_v42 }
 0x1bb   : > { %4791 = vmatprep.subr.bf16.mxu1 %v5350_v43  ;;  %4812 = vmatpush3.bf16.msra.mxu0 %v5358_v55  ;;  %v5372_v55 = vld [vmem:[%s6836_s26 + $0x88] sm:$0xff]  }
 0x1bc   : > { %4813 = vmatprep.subr.bf16.mxu0 %v5359_v57 }
 0x1be   : > { %4792 = vmatpush3.bf16.msra.mxu1 %v5350_v43 }
 0x1bf   : > { %4793 = vmatprep.subr.bf16.mxu1 %v5351_v44  ;;  %4814 = vmatpush3.bf16.msra.mxu0 %v5359_v57  ;;  %v5373_v57 = vld [vmem:[%s6836_s26 + $0x90] sm:$0xff]  }
 0x1c0   : > { %4815 = vmatprep.subr.bf16.mxu0 %v5360_v58 }
 0x1c2   : > { %4794 = vmatpush3.bf16.msra.mxu1 %v5351_v44 }
 0x1c3   : > { %4795 = vmatprep.subr.bf16.mxu1 %v5352_v45  ;;  %4816 = vmatpush3.bf16.msra.mxu0 %v5360_v58  ;;  %v5374_v58 = vld [vmem:[%s6836_s26 + $0x98] sm:$0xff]  }
 0x1c4   : > { %4817 = vmatprep.subr.bf16.mxu0 %v5361_v59 }
 0x1c6   : > { %4796 = vmatpush3.bf16.msra.mxu1 %v5352_v45 }
 0x1c7   : > { %4797 = vmatprep.subr.bf16.mxu1 %v5353_v46  ;;  %4818 = vmatpush3.bf16.msra.mxu0 %v5361_v59  ;;  %v5375_v59 = vld [vmem:[%s6836_s26 + $0xa0] sm:$0xff]  }
 0x1c8   : > { %4819 = vmatprep.subr.bf16.mxu0 %v5362_v60 }
 0x1ca   : > { %4798 = vmatpush3.bf16.msra.mxu1 %v5353_v46 }
 0x1cb   : > { %4799 = vmatprep.subr.bf16.mxu1 %v5354_v47  ;;  %4820 = vmatpush3.bf16.msra.mxu0 %v5362_v60  ;;  %v5376_v60 = vld [vmem:[%s6836_s26 + $0xa8] sm:$0xff]  }
 0x1cc   : > { %4825 = vmatprep.subr.bf16.mxu0 %v5363_v61 }
 0x1ce   : > { %4800 = vmatpush3.bf16.msra.mxu1 %v5354_v47 }
 0x1d1   : > { %4802 = vmatmul.mubr.msk.bf16.vlgmr.msra.gmra.mrb[0].mxu1 %vm5993_vm6, %v4096_v51  ;;  %v5368_v51 = vld [vmem:[%s6836_s26 + $0x28] sm:$0xff]  }
 0x281   : > { %v4763_v62 = vpop.f32.mrb[4].mxu0 }
 0x282   : > { %v1310_v63 = vpop.f32.mrb[5].mxu0 }
 0x283   : > { %v4764_v0 = vpop.f32.mrb[6].mxu0 }
 0x284   : > { %v1313_v1 = vpop.f32.mrb[7].mxu0 }
 0x2a4   : > { %v4803_v2 = vpop.f32.mrb[0].mxu1 }
 0x2a5   : > { %v5207_v4 = vadd.f32 %v4803_v2, %v4763_v62  ;;  %v1521_v5 = vpop.f32.mrb[1].mxu1  ;;  %v5378_v62 = vld [vmem:[%s6836_s26 + $0xb8] sm:$0xff]   ;;  %v5380_v2 = vld [vmem:[%s6786_s8 + $0x48] sm:$0xff]  }
 0x2a6   : > { %v5208_v6 = vadd.f32 %v1521_v5, %v1310_v63  ;;  %v4804_v7 = vpop.f32.mrb[2].mxu1  ;;  %v1949_v63 = vld [vmem:[#allocation2] sm:$0xff]  ;;  %v5384_v5 = vld [vmem:[%s6786_s8 + $0x68] sm:$0xff]  }
 0x2a7   : > { %v1549_v8 = vadd.f32 %v5207_v4, %v4098_v3  ;;  %v5209_v9 = vadd.f32 %v4804_v7, %v4764_v0  ;;  %v1524_v10 = vpop.f32.mrb[3].mxu1  ;;  %v5379_v0 = vld [vmem:[%s6786_s8 + $0x40] sm:$0xff]  }
 0x2a8   : > { %v1547_v12 = vadd.f32 %v5208_v6, %v4098_v3  ;;  %v5210_v13 = vadd.f32 %v1524_v10, %v1313_v1  ;;  %v5607_v1 = vmov 0.0   ;;  %v5383_v4 = vld [vmem:[%s6786_s8 + $0x60] sm:$0xff]  }
 0x2a9   : > { %v1553_v14 = vmax.f32 %v1549_v8, 0.0  ;;  %v1550_v16 = vadd.f32 %v5209_v9, %v4098_v3  ;;  %4885 = vmatprep.subr.bf16.mxu1 %v5607_v1  ;;  %v4161_v6 = vld [vmem:[%s6838_s5] ss:$0 sm:$0xff]  ;;  %4901 = vmatprep.mubr.msk.bf16.mxu1 %vm5608_vm8, %v5607_v1  ;;  %s6840_s5 = sld [smem:[#allocation18_spill]] }
 0x2aa   : > { %v1551_v17 = vmax.f32 %v1547_v12, 0.0  ;;  %v1548_v19 = vadd.f32 %v5210_v13, %v4098_v3  ;;  %4886 = vmatpush3.bf16.msra.mxu1 %v5379_v0  ;;  %v5382_v3 = vld [vmem:[%s6786_s8 + $0x58] sm:$0xff]   ;;  %v5405_v0 = vld [vmem:[%s6788_s10 + $0x50] sm:$0xff]  }
 0x2ab   : > { %v1554_v22 = vmax.f32 %v1550_v16, 0.0  ;;  %v1557_v23 = vrot.slane %v1553_v14, 7  ;;  %v1573_v28 = vrot.slane %v1553_v14, 1  ;;  %4887 = vmatprep.subr.bf16.mxu1 %v5607_v1 }
 0x2ac   : > { %v1555_v25 = vrot.slane %v1551_v17, 7  ;;  %v1571_v26 = vrot.slane %v1551_v17, 1  ;;  %v1552_v27 = vmax.f32 %v1548_v19, 0.0 }
 0x2ad   : > { %v1558_v29 = vrot.slane %v1554_v22, 7  ;;  %v1574_v30 = vrot.slane %v1554_v22, 1  ;;  %v1570_v31 = vpack.c.bf16 %v1554_v22, %v1553_v14 }
 0x2ae   : > { %v1556_v32 = vrot.slane %v1552_v27, 7  ;;  %v1572_v33 = vrot.slane %v1552_v27, 1  ;;  %v1569_v34 = vpack.c.bf16 %v1552_v27, %v1551_v17  ;;  %4888 = vmatpush3.bf16.msra.mxu1 %v5380_v2  ;;  %v5406_v2 = vld [vmem:[%s6788_s10 + $0x58] sm:$0xff]  }
 0x2af   : > { %v6143_v35 = vsel %vm790_vm4, %v1573_v28, %v1574_v30  ;;  %v6147_v36 = vsel %vm790_vm4, %v1574_v30, %v1571_v26  ;;  %v1562_v37 = vsel %vm766_vm0, %v1558_v29, %v1555_v25  ;;  %v1559_v39 = vsel %vm766_vm0, %v1557_v23, %v1558_v29  ;;  %4889 = vmatprep.subr.bf16.mxu1 %v5607_v1 }
 0x2b0   : > { %4821 = vmatprep.mubr.bf16.mxu0 %v1569_v34  ;;  %v1561_v40 = vsel %vm766_vm0, %v1555_v25, %v1556_v32  ;;  %v1560_v41 = vsel %vm766_vm0, %v1556_v32, %v1557_v23  ;;  %v1576_v42 = vsel %vm790_vm4, %v1572_v33, %v1573_v28  ;;  %v1577_v43 = vsel %vm790_vm4, %v1571_v26, %v1572_v33  ;;  %v5385_v32 = vld [vmem:[%s6786_s8 + $0x70] sm:$0xff]   ;;  %v5386_v33 = vld [vmem:[%s6786_s8 + $0x78] sm:$0xff]  }
 0x2b1   : > { %4822 = vmatmul.mubr.bf16.vlgmr.msra.gmra.mrb[8].mxu0 %v1570_v31  ;;  %v4132_v44 = vpack.c.bf16 %v1561_v40, %v1562_v37  ;;  %v1568_v45 = vpack.c.bf16 %v1559_v39, %v1560_v41  ;;  %v1583_v46 = vpack.c.bf16 %v1576_v42, %v1577_v43  ;;  %v4159_v47 = vpack.c.bf16 %v6147_v36, %v6143_v35  ;;  %v1951_v31 = vld [vmem:[#allocation2 + $0x10] sm:$0xff]  ;;  %v1956_v35 = vld [vmem:[#allocation2 + $0x38] sm:$0xff]  ;;  %v5387_v41 = vld [vmem:[%s6786_s8] sm:$0xff]  }
 0x2b2   : > { %4826 = vmatpush3.bf16.msra.mxu0 %v5363_v61  ;;  %v5377_v61 = vld [vmem:[%s6836_s26 + $0xb0] sm:$0xff]   ;;  %4890 = vmatpush3.bf16.msra.mxu1 %v5381_v56  ;;  %v5407_v56 = vld [vmem:[%s6788_s10 + $0x60] sm:$0xff]  }
 0x2b3   : > { %4841 = vmatprep.mubr.msk.bf16.mxu0 %vm5908_vm3, %v4132_v44  ;;  %4827 = vmatprep.subr.bf16.mxu0 %v5364_v38  ;;  %v1955_v34 = vld [vmem:[#allocation2 + $0x30] sm:$0xff]  ;;  %v5388_v44 = vld [vmem:[%s6786_s8 + $0x8] sm:$0xff]  }
 0x2b4   : > { %4891 = vmatprep.subr.bf16.mxu1 %v5607_v1 }
 0x2b6   : > { %4828 = vmatpush3.bf16.msra.mxu0 %v5364_v38  ;;  %4892 = vmatpush3.bf16.msra.mxu1 %v5382_v3  ;;  %v5408_v3 = vld [vmem:[%s6788_s10 + $0x68] sm:$0xff]  }
 0x2b7   : > { %4829 = vmatprep.subr.bf16.mxu0 %v5365_v48  ;;  %4893 = vmatprep.subr.bf16.mxu1 %v5607_v1 }
 0x2ba   : > { %4830 = vmatpush3.bf16.msra.mxu0 %v5365_v48  ;;  %4894 = vmatpush3.bf16.msra.mxu1 %v5383_v4  ;;  %v5390_v48 = vld [vmem:[%s6786_s8 + $0x18] sm:$0xff]   ;;  %v5409_v4 = vld [vmem:[%s6788_s10 + $0x70] sm:$0xff]  }
 0x2bb   : > { %4831 = vmatprep.subr.bf16.mxu0 %v5366_v49  ;;  %4895 = vmatprep.subr.bf16.mxu1 %v5607_v1 }
 0x2be   : > { %4832 = vmatpush3.bf16.msra.mxu0 %v5366_v49  ;;  %4896 = vmatpush3.bf16.msra.mxu1 %v5384_v5  ;;  %v5391_v49 = vld [vmem:[%s6786_s8 + $0x20] sm:$0xff]   ;;  %v5410_v5 = vld [vmem:[%s6788_s10 + $0x78] sm:$0xff]  }
 0x2bf   : > { %4833 = vmatprep.subr.bf16.mxu0 %v5367_v50  ;;  %4897 = vmatprep.subr.bf16.mxu1 %v5607_v1 }
 0x2c2   : > { %4834 = vmatpush3.bf16.msra.mxu0 %v5367_v50  ;;  %4898 = vmatpush3.bf16.msra.mxu1 %v5385_v32  ;;  %v5392_v50 = vld [vmem:[%s6786_s8 + $0x28] sm:$0xff]  }
 0x2c3   : > { %4835 = vmatprep.subr.bf16.mxu0 %v5368_v51  ;;  %4899 = vmatprep.subr.bf16.mxu1 %v5607_v1 }
 0x2c6   : > { %4836 = vmatpush3.bf16.msra.mxu0 %v5368_v51  ;;  %4900 = vmatpush3.bf16.msra.mxu1 %v5386_v33  ;;  %v5393_v51 = vld [vmem:[%s6786_s8 + $0x30] sm:$0xff]   ;;  %v5411_v33 = vld [vmem:[%s6788_s10] sm:$0xff]  }
 0x2c7   : > { %4837 = vmatprep.subr.bf16.mxu0 %v5369_v52  ;;  %4905 = vmatprep.subr.bf16.mxu1 %v5607_v1 }
 0x2ca   : > { %4838 = vmatpush3.bf16.msra.mxu0 %v5369_v52  ;;  %v5394_v52 = vld [vmem:[%s6786_s8 + $0x38] sm:$0xff]  }
 0x2cb   : > { %4839 = vmatprep.subr.bf16.mxu0 %v5370_v53 }
 0x2ce   : > { %4840 = vmatpush3.bf16.msra.mxu0 %v5370_v53  ;;  %v5395_v53 = vld [vmem:[%s6786_s8 + $0x80] sm:$0xff]  }
 0x2cf   : > { %4845 = vmatprep.subr.bf16.mxu0 %v5371_v54 }
 0x2d1   : > { %4842 = vmatmul.mubr.bf16.vlgmr.msra.gmra.mrb[8].mxu0 %v1568_v45 }
 0x2d2   : > { %4846 = vmatpush3.bf16.msra.mxu0 %v5371_v54  ;;  %4861 = vmatprep.mubr.bf16.mxu0 %v1583_v46  ;;  %v5396_v54 = vld [vmem:[%s6786_s8 + $0x88] sm:$0xff]  }
 0x2d3   : > { %4847 = vmatprep.subr.bf16.mxu0 %v5372_v55 }
 0x2d6   : > { %4848 = vmatpush3.bf16.msra.mxu0 %v5372_v55  ;;  %v5397_v55 = vld [vmem:[%s6786_s8 + $0x90] sm:$0xff]  }
 0x2d7   : > { %4849 = vmatprep.subr.bf16.mxu0 %v5373_v57 }
 0x2da   : > { %4850 = vmatpush3.bf16.msra.mxu0 %v5373_v57  ;;  %v5398_v57 = vld [vmem:[%s6786_s8 + $0x98] sm:$0xff]  }
 0x2db   : > { %4851 = vmatprep.subr.bf16.mxu0 %v5374_v58 }
 0x2de   : > { %4852 = vmatpush3.bf16.msra.mxu0 %v5374_v58  ;;  %v5399_v58 = vld [vmem:[%s6786_s8 + $0xa0] sm:$0xff]  }
 0x2df   : > { %4853 = vmatprep.subr.bf16.mxu0 %v5375_v59 }
 0x2e2   : > { %4854 = vmatpush3.bf16.msra.mxu0 %v5375_v59  ;;  %v5400_v59 = vld [vmem:[%s6786_s8 + $0xa8] sm:$0xff]  }
 0x2e3   : > { %4855 = vmatprep.subr.bf16.mxu0 %v5376_v60 }
 0x2e6   : > { %4856 = vmatpush3.bf16.msra.mxu0 %v5376_v60  ;;  %v5401_v60 = vld [vmem:[%s6786_s8 + $0xb0] sm:$0xff]  }
 0x2e7   : > { %4857 = vmatprep.subr.bf16.mxu0 %v5377_v61 }
 0x2ea   : > { %4858 = vmatpush3.bf16.msra.mxu0 %v5377_v61  ;;  %v5402_v61 = vld [vmem:[%s6786_s8 + $0xb8] sm:$0xff]  }
 0x2eb   : > { %4859 = vmatprep.subr.bf16.mxu0 %v5378_v62 }
 0x2ee   : > { %4860 = vmatpush3.bf16.msra.mxu0 %v5378_v62  ;;  %v5403_v62 = vld [vmem:[%s6788_s10 + $0x40] sm:$0xff]  }
 0x2f1   : > { %4862 = vmatmul.mubr.msk.bf16.vlgmr.msra.gmra.mrb[8].mxu0 %vm5993_vm6, %v4159_v47  ;;  %v5389_v47 = vld [vmem:[%s6786_s8 + $0x10] sm:$0xff]  }
 0x2f2   : > { %4873 = vmatprep.mubr.msk.f32.mxu0 %vm1957_vm7, %v1949_v63  ;;  %v5404_v63 = vld [vmem:[%s6788_s10 + $0x48] sm:$0xff]  }
 0x3c4   : > { %v4863_v7 = vpop.f32.mrb[8].mxu0 }
 0x3c5   : > { %v1939_v8 = vadd.f32 %v4863_v7, %v4161_v6  ;;  %v1911_v9 = vpop.f32.mrb[9].mxu0 }
 0x3c6   : > { %v1937_v10 = vadd.f32 %v4161_v6, %v1911_v9  ;;  %v4864_v12 = vpop.f32.mrb[10].mxu0 }
 0x3c7   : > { %v1943_v13 = vadd.f32 %v1939_v8, %v6050_v15  ;;  %v1940_v14 = vadd.f32 %v4864_v12, %v4161_v6  ;;  %v1914_v16 = vpop.f32.mrb[11].mxu0  ;;  %v1950_v15 = vld [vmem:[#allocation2 + $0x8] sm:$0xff] }
 0x3c8   : > { %v1941_v17 = vadd.f32 %v1937_v10, %v6052_v18  ;;  %v1938_v19 = vadd.f32 %v4161_v6, %v1914_v16  ;;  %v1952_v18 = vld [vmem:[#allocation2 + $0x18] sm:$0xff] }
 0x3c9   : > { %v1944_v22 = vadd.f32 %v1940_v14, %v6054_v20  ;;  %v1947_v25 = vmax.f32 %v1943_v13, 0.0  ;;  %v1953_v20 = vld [vmem:[#allocation2 + $0x20] sm:$0xff] }
 0x3ca   : > { %v1942_v23 = vadd.f32 %v1938_v19, %v6056_v21  ;;  %v1945_v27 = vmax.f32 %v1941_v17, 0.0  ;;  %v1954_v21 = vld [vmem:[#allocation2 + $0x28] sm:$0xff] }
 0x3cb   : > { %v1948_v26 = vmax.f32 %v1944_v22, 0.0 }
 0x3cc   : > { %v1946_v28 = vmax.f32 %v1942_v23, 0.0 }
 0x3cd   : > { %v5199_v29 = vpack.c.bf16 %v1948_v26, %v1947_v25  ;;  %v4226_v26 = vld [vmem:[%s6787_s9] ss:$0 sm:$0xff] }
 0x3ce   : > { %v5195_v30 = vpack.c.bf16 %v1946_v28, %v1945_v27 }
 0x3d0   : > { %5196 = vmatprep.subr.bf16.mxu0 %v5195_v30 }
 0x3d1   : > { %5198 = vmatpush3.bf16.msra.mxu0 %v5195_v30 }
 0x3d2   : > { %5200 = vmatprep.subr.bf16.mxu0 %v5199_v29 }
 0x3d5   : > { %5202 = vmatpush3.bf16.msra.mxu0 %v5199_v29 }
 0x3d6   : > { %4945 = vmatprep.subr.bf16.mxu0 %v5607_v1 }
 0x3d8   : > { %4874 = vmatmul.mubr.msk.f32.vlgmr.msra.gmra.mrb[12].mxu0 %vm1957_vm7, %v1950_v15 }
 0x3d9   : > { %4876 = vmatprep.mubr.msk.f32.mxu0 %vm1957_vm7, %v1951_v31  ;;  %4946 = vmatpush3.bf16.msra.mxu0 %v5403_v62  ;;  %v5429_v62 = vld [vmem:[%s6790_s12 + $0x10] sm:$0xff]  }
 0x3da   : > { %4947 = vmatprep.subr.bf16.mxu0 %v5607_v1 }
 0x3dc   : > { %4877 = vmatmul.mubr.msk.f32.gmra.mrb[14].mxu0 %vm1957_vm7, %v1952_v18 }
 0x3dd   : > { %4879 = vmatprep.mubr.msk.f32.mxu0 %vm1957_vm7, %v1953_v20  ;;  %4948 = vmatpush3.bf16.msra.mxu0 %v5404_v63  ;;  %v5430_v63 = vld [vmem:[%s6790_s12 + $0x18] sm:$0xff]  }
 0x3de   : > { %4949 = vmatprep.subr.bf16.mxu0 %v5607_v1 }
 0x3e0   : > { %4880 = vmatmul.mubr.msk.f32.gmra.mrb[16].mxu0 %vm1957_vm7, %v1954_v21 }
 0x3e1   : > { %4882 = vmatprep.mubr.msk.f32.mxu0 %vm1957_vm7, %v1955_v34  ;;  %4950 = vmatpush3.bf16.msra.mxu0 %v5405_v0  ;;  %v5431_v0 = vld [vmem:[%s6790_s12 + $0x20] sm:$0xff]  }
 0x3e2   : > { %4951 = vmatprep.subr.bf16.mxu0 %v5607_v1 }
 0x3e4   : > { %4883 = vmatmul.mubr.msk.f32.gmra.mrb[18].mxu0 %vm1957_vm7, %v1956_v35 }
 0x3e5   : > { %4961 = vmatprep.mubr.msk.bf16.mxu0 %vm5608_vm8, %v5607_v1  ;;  %4952 = vmatpush3.bf16.msra.mxu0 %v5406_v2  ;;  %v5432_v2 = vld [vmem:[%s6790_s12 + $0x28] sm:$0xff]  }
 0x3e6   : > { %4953 = vmatprep.subr.bf16.mxu0 %v5607_v1 }
 0x3e9   : > { %4954 = vmatpush3.bf16.msra.mxu0 %v5407_v56  ;;  %v5433_v56 = vld [vmem:[%s6790_s12 + $0x30] sm:$0xff]  }
 0x3ea   : > { %4955 = vmatprep.subr.bf16.mxu0 %v5607_v1 }
 0x3ed   : > { %4956 = vmatpush3.bf16.msra.mxu0 %v5408_v3  ;;  %v5434_v3 = vld [vmem:[%s6790_s12 + $0x38] sm:$0xff]  }
 0x3ee   : > { %4957 = vmatprep.subr.bf16.mxu0 %v5607_v1 }
 0x3f1   : > { %4958 = vmatpush3.bf16.msra.mxu0 %v5409_v4  ;;  %v2882_v4 = vld [vmem:[#allocation4] sm:$0xff] }
 0x3f2   : > { %4959 = vmatprep.subr.bf16.mxu0 %v5607_v1 }
 0x3f5   : > { %4960 = vmatpush3.bf16.msra.mxu0 %v5410_v5  ;;  %v4289_v5 = vld [vmem:[%s6789_s11] ss:$0 sm:$0xff] }
 0x3f6   : > { %4965 = vmatprep.subr.bf16.mxu0 %v5607_v1 }
 0x4ab   : > { %v4875_v36 = vpop.f32.mrb[12].mxu0 }
 0x4ac   : > { %v2048_v37 = vpop.f32.mrb[13].mxu0 }
 0x4ad   : > { %v2087_v38 = vpack.c.bf16 %v4875_v36, %v2048_v37 }
 0x4af   : > { %v4878_v39 = vpop.f32.mrb[14].mxu0 }
 0x4b0   : > { %v2058_v40 = vpop.f32.mrb[15].mxu0 }
 0x4b1   : > { %v2088_v42 = vpack.c.bf16 %v4878_v39, %v2058_v40 }
 0x4b3   : > { %4902 = vmatmul.mubr.bf16.vlgmr.msra.gmra.mrb[4].mxu1 %v2088_v42  ;;  %v4881_v43 = vpop.f32.mrb[16].mxu0  ;;  %v5412_v42 = vld [vmem:[%s6788_s10 + $0x8] sm:$0xff]  }
 0x4b4   : > { %4906 = vmatpush3.bf16.msra.mxu1 %v5387_v41  ;;  %4921 = vmatprep.mubr.msk.bf16.mxu1 %vm5608_vm8, %v5607_v1  ;;  %v2068_v45 = vpop.f32.mrb[17].mxu0 }
 0x4b5   : > { %4907 = vmatprep.subr.bf16.mxu1 %v5607_v1  ;;  %v2089_v46 = vpack.c.bf16 %v4881_v43, %v2068_v45  ;;  %v5413_v45 = vld [vmem:[%s6788_s10 + $0x10] sm:$0xff]  }
 0x4b7   : > { %v6364_v19 = vpop.f32.mrb[18].mxu0 }
 0x4b8   : > { %4908 = vmatpush3.bf16.msra.mxu1 %v5388_v44  ;;  %v6366_v22 = vpop.f32.mrb[19].mxu0 }
 0x4b9   : > { %4909 = vmatprep.subr.bf16.mxu1 %v5607_v1  ;;  %v2090_v23 = vpack.c.bf16 %v6364_v19, %v6366_v22  ;;  %v2883_v22 = vld [vmem:[#allocation4 + $0x8] sm:$0xff] }
 0x4bc   : > { %4910 = vmatpush3.bf16.msra.mxu1 %v5389_v47  ;;  %v5415_v47 = vld [vmem:[%s6788_s10 + $0x20] sm:$0xff]  }
 0x4bd   : > { %4911 = vmatprep.subr.bf16.mxu1 %v5607_v1 }
 0x4c0   : > { %4912 = vmatpush3.bf16.msra.mxu1 %v5390_v48  ;;  %v5416_v48 = vld [vmem:[%s6788_s10 + $0x28] sm:$0xff]  }
 0x4c1   : > { %4913 = vmatprep.subr.bf16.mxu1 %v5607_v1 }
 0x4c4   : > { %4914 = vmatpush3.bf16.msra.mxu1 %v5391_v49  ;;  %v5417_v49 = vld [vmem:[%s6788_s10 + $0x30] sm:$0xff]  }
 0x4c5   : > { %4915 = vmatprep.subr.bf16.mxu1 %v5607_v1 }
 0x4c8   : > { %4916 = vmatpush3.bf16.msra.mxu1 %v5392_v50  ;;  %v5418_v50 = vld [vmem:[%s6788_s10 + $0x38] sm:$0xff]  }
 0x4c9   : > { %4917 = vmatprep.subr.bf16.mxu1 %v5607_v1 }
 0x4cc   : > { %4918 = vmatpush3.bf16.msra.mxu1 %v5393_v51  ;;  %v5419_v51 = vld [vmem:[%s6788_s10 + $0x80] sm:$0xff]  }
 0x4cd   : > { %4919 = vmatprep.subr.bf16.mxu1 %v5607_v1 }
 0x4d0   : > { %4920 = vmatpush3.bf16.msra.mxu1 %v5394_v52  ;;  %v5420_v52 = vld [vmem:[%s6788_s10 + $0x88] sm:$0xff]  }
 0x4d1   : > { %4925 = vmatprep.subr.bf16.mxu1 %v5607_v1 }
 0x4d3   : > { %4922 = vmatmul.mubr.bf16.vlgmr.msra.gmra.mrb[8].mxu1 %v2087_v38 }
 0x4d4   : > { %4926 = vmatpush3.bf16.msra.mxu1 %v5395_v53  ;;  %4941 = vmatprep.mubr.msk.bf16.mxu1 %vm5608_vm8, %v5607_v1  ;;  %v5421_v53 = vld [vmem:[%s6788_s10 + $0x90] sm:$0xff]  }
 0x4d5   : > { %4927 = vmatprep.subr.bf16.mxu1 %v5607_v1 }
 0x4d8   : > { %4928 = vmatpush3.bf16.msra.mxu1 %v5396_v54  ;;  %v5423_v54 = vld [vmem:[%s6788_s10 + $0xa0] sm:$0xff]  }
 0x4d9   : > { %4929 = vmatprep.subr.bf16.mxu1 %v5607_v1 }
 0x4dc   : > { %4930 = vmatpush3.bf16.msra.mxu1 %v5397_v55  ;;  %v5424_v55 = vld [vmem:[%s6788_s10 + $0xa8] sm:$0xff]  }
 0x4dd   : > { %4931 = vmatprep.subr.bf16.mxu1 %v5607_v1 }
 0x4e0   : > { %4932 = vmatpush3.bf16.msra.mxu1 %v5398_v57  ;;  %v5425_v57 = vld [vmem:[%s6788_s10 + $0xb0] sm:$0xff]  }
 0x4e1   : > { %4933 = vmatprep.subr.bf16.mxu1 %v5607_v1 }
 0x4e4   : > { %4934 = vmatpush3.bf16.msra.mxu1 %v5399_v58  ;;  %v771_v58 = vadd.s32 8, %v5874_v11 }
 0x4e5   : > { %4935 = vmatprep.subr.bf16.mxu1 %v5607_v1 }
 0x4e6   : > { %vm2434_vm9 = vcmp.lt.s32.totalorder %v771_v58, 15  ;;  %v5464_v58 = vld [vmem:[%s6795_s17 + $0x68] sm:$0xff]  }
 0x4e7   : > { %vm4286_vm10 = vmpackc.low %vm2434_vm9, %vm5606_vm2 }
 0x4e8   : > { %4936 = vmatpush3.bf16.msra.mxu1 %v5400_v59  ;;  %v5426_v59 = vld [vmem:[%s6788_s10 + $0xb8] sm:$0xff]  }
 0x4e9   : > { %4937 = vmatprep.subr.bf16.mxu1 %v5607_v1 }
 0x4ec   : > { %4938 = vmatpush3.bf16.msra.mxu1 %v5401_v60  ;;  %v5427_v60 = vld [vmem:[%s6790_s12] sm:$0xff]  }
 0x4ed   : > { %4939 = vmatprep.subr.bf16.mxu1 %v5607_v1 }
 0x4f0   : > { %4940 = vmatpush3.bf16.msra.mxu1 %v5402_v61  ;;  %v5428_v61 = vld [vmem:[%s6790_s12 + $0x8] sm:$0xff]  }
 0x4f3   : > { %4942 = vmatmul.mubr.bf16.vlgmr.msra.gmra.mrb[12].mxu1 %v2089_v46  ;;  %v5414_v46 = vld [vmem:[%s6788_s10 + $0x18] sm:$0xff]  }
 0x4f4   : > { %5029 = vmatprep.mubr.msk.f32.mxu1 %vm2886_vm11, %v2882_v4 }
 0x586   : > { %v2206_v6 = vpop.f32.mrb[4].mxu1 }
 0x587   : > { %v4903_v7 = vpop.f32.mrb[5].mxu1 }
 0x588   : > { %v2209_v8 = vpop.f32.mrb[6].mxu1 }
 0x589   : > { %v4904_v9 = vpop.f32.mrb[7].mxu1 }
 0x5a6   : > { %v2295_v10 = vpop.f32.mrb[8].mxu1 }
 0x5a7   : > { %v2296_v12 = vadd.f32 %v2295_v10, %v2206_v6  ;;  %v4923_v13 = vpop.f32.mrb[9].mxu1  ;;  %v4290_v6 = vld [vmem:[%s6791_s13] ss:$0 sm:$0xff] }
 0x5a8   : > { %v2298_v14 = vpop.f32.mrb[10].mxu1  ;;  %v5211_v7 = vadd.f32 %v4290_v6, %v4289_v5  ;;  %v5491_v6 = vld [vmem:[#allocation6] sm:$0xff]  }
 0x5a9   : > { %v2299_v16 = vadd.f32 %v2298_v14, %v2209_v8  ;;  %v4924_v17 = vpop.f32.mrb[11].mxu1 }
 0x5c6   : > { %v2401_v25 = vpop.f32.mrb[12].mxu1 }
 0x5c7   : > { %v2408_v27 = vadd.f32 %v2401_v25, %v2296_v12  ;;  %v4943_v28 = vpop.f32.mrb[13].mxu1  ;;  %v2884_v25 = vld [vmem:[#allocation4 + $0x10] sm:$0xff] }
 0x5c8   : > { %v2404_v29 = vpop.f32.mrb[14].mxu1  ;;  %v5437_v28 = vld [vmem:[%s6793_s15 + $0x50] sm:$0xff]  }
 0x5c9   : > { %v2417_v30 = vadd.f32 %v4226_v26, %v2408_v27  ;;  %v2409_v15 = vadd.f32 %v2404_v29, %v2299_v16  ;;  %v4944_v31 = vpop.f32.mrb[15].mxu1  ;;  %v5436_v27 = vld [vmem:[%s6793_s15 + $0x48] sm:$0xff]   ;;  %v5438_v29 = vld [vmem:[%s6793_s15 + $0x58] sm:$0xff]  }
 0x5ca   : > { %v5441_v31 = vld [vmem:[%s6793_s15 + $0x70] sm:$0xff]  }
 0x5cb   : > { %v2419_v18 = vmax.f32 %v2417_v30, 0.0  ;;  %v2418_v20 = vadd.f32 %v4226_v26, %v2409_v15  ;;  %v2885_v26 = vld [vmem:[#allocation4 + $0x18] sm:$0xff]  ;;  %v5439_v30 = vld [vmem:[%s6793_s15 + $0x60] sm:$0xff]   ;;  %v5440_v15 = vld [vmem:[%s6793_s15 + $0x68] sm:$0xff]  }
 0x5cd   : > { %v2420_v21 = vmax.f32 %v2418_v20, 0.0  ;;  %v2421_v32 = vrot.slane %v2419_v18, 7  ;;  %v2429_v34 = vrot.slane %v2419_v18, 1 }
 0x5cf   : > { %v2422_v35 = vrot.slane %v2420_v21, 7  ;;  %v2428_v36 = vpack.c.bf16 %v2420_v21, %v2419_v18  ;;  %v2430_v37 = vrot.slane %v2420_v21, 1  ;;  %v5442_v18 = vld [vmem:[%s6793_s15 + $0x78] sm:$0xff]   ;;  %v5443_v21 = vld [vmem:[%s6793_s15] sm:$0xff]  }
 0x5d1   : > { %v2423_v38 = vsel %vm766_vm0, %v2421_v32, %v2422_v35  ;;  %v2424_v39 = vsel %vm766_vm0, %v2422_v35, %v2421_v32  ;;  %v2431_v40 = vsel %vm790_vm4, %v2429_v34, %v2430_v37  ;;  %v2432_v41 = vsel %vm790_vm4, %v2430_v37, %v2429_v34  ;;  %4962 = vmatmul.mubr.bf16.vlgmr.msra.gmra.mrb[20].mxu0 %v2428_v36  ;;  %v5444_v34 = vld [vmem:[%s6793_s15 + $0x8] sm:$0xff]   ;;  %v5445_v37 = vld [vmem:[%s6793_s15 + $0x10] sm:$0xff]  }
 0x5d2   : > { %4966 = vmatpush3.bf16.msra.mxu0 %v5411_v33  ;;  %4981 = vmatprep.mubr.msk.bf16.mxu0 %vm5608_vm8, %v5607_v1  ;;  %v4260_v43 = vpack.c.bf16 %v2423_v38, %v2424_v39  ;;  %v4287_v44 = vpack.c.bf16 %v2432_v41, %v2431_v40  ;;  %v5446_v38 = vld [vmem:[%s6793_s15 + $0x18] sm:$0xff]   ;;  %v5447_v39 = vld [vmem:[%s6793_s15 + $0x20] sm:$0xff]   ;;  %v5448_v40 = vld [vmem:[%s6793_s15 + $0x28] sm:$0xff]  }
 0x5d3   : > { %4967 = vmatprep.subr.bf16.mxu0 %v5607_v1  ;;  %v5449_v41 = vld [vmem:[%s6793_s15 + $0x30] sm:$0xff]  }
 0x5d6   : > { %4968 = vmatpush3.bf16.msra.mxu0 %v5412_v42  ;;  %v5450_v42 = vld [vmem:[%s6793_s15 + $0x38] sm:$0xff]  }
 0x5d7   : > { %4969 = vmatprep.subr.bf16.mxu0 %v5607_v1 }
 0x5da   : > { %4970 = vmatpush3.bf16.msra.mxu0 %v5413_v45  ;;  %v5452_v45 = vld [vmem:[%s6793_s15 + $0x88] sm:$0xff]  }
 0x5db   : > { %4971 = vmatprep.subr.bf16.mxu0 %v5607_v1 }
 0x5de   : > { %4972 = vmatpush3.bf16.msra.mxu0 %v5414_v46  ;;  %v5453_v46 = vld [vmem:[%s6793_s15 + $0x90] sm:$0xff]  }
 0x5df   : > { %4973 = vmatprep.subr.bf16.mxu0 %v5607_v1 }
 0x5e2   : > { %4974 = vmatpush3.bf16.msra.mxu0 %v5415_v47  ;;  %v5454_v47 = vld [vmem:[%s6793_s15 + $0x98] sm:$0xff]  }
 0x5e3   : > { %4975 = vmatprep.subr.bf16.mxu0 %v5607_v1 }
 0x5e6   : > { %4976 = vmatpush3.bf16.msra.mxu0 %v5416_v48  ;;  %v5455_v48 = vld [vmem:[%s6793_s15 + $0xa0] sm:$0xff]  }
 0x5e7   : > { %4977 = vmatprep.subr.bf16.mxu0 %v5607_v1 }
 0x5ea   : > { %4978 = vmatpush3.bf16.msra.mxu0 %v5417_v49  ;;  %v5456_v49 = vld [vmem:[%s6793_s15 + $0xa8] sm:$0xff]  }
 0x5eb   : > { %4979 = vmatprep.subr.bf16.mxu0 %v5607_v1 }
 0x5ee   : > { %4980 = vmatpush3.bf16.msra.mxu0 %v5418_v50  ;;  %v5457_v50 = vld [vmem:[%s6793_s15 + $0xb0] sm:$0xff]  }
 0x5ef   : > { %4985 = vmatprep.subr.bf16.mxu0 %v5607_v1 }
 0x5f1   : > { %4982 = vmatmul.mubr.msk.bf16.vlgmr.msra.gmra.mrb[20].mxu0 %vm5908_vm3, %v4260_v43  ;;  %v5451_v43 = vld [vmem:[%s6793_s15 + $0x80] sm:$0xff]  }
 0x5f2   : > { %4986 = vmatpush3.bf16.msra.mxu0 %v5419_v51  ;;  %5001 = vmatprep.mubr.msk.bf16.mxu0 %vm5608_vm8, %v5607_v1  ;;  %v5458_v51 = vld [vmem:[%s6793_s15 + $0xb8] sm:$0xff]  }
 0x5f3   : > { %4987 = vmatprep.subr.bf16.mxu0 %v5607_v1 }
 0x5f6   : > { %4988 = vmatpush3.bf16.msra.mxu0 %v5420_v52 }
 0x5f7   : > { %4989 = vmatprep.subr.bf16.mxu0 %v5607_v1 }
 0x5fa   : > { %4990 = vmatpush3.bf16.msra.mxu0 %v5421_v53  ;;  %v5459_v53 = vld [vmem:[%s6795_s17 + $0x40] sm:$0xff]  }
 0x5fb   : > { %4991 = vmatprep.subr.bf16.mxu0 %v5607_v1 }
 0x5fe   : > { %4992 = vmatpush3.bf16.msra.mxu0 %v5422_v24  ;;  %v5460_v24 = vld [vmem:[%s6795_s17 + $0x48] sm:$0xff]  }
 0x5ff   : > { %4993 = vmatprep.subr.bf16.mxu0 %v5607_v1 }
 0x602   : > { %4994 = vmatpush3.bf16.msra.mxu0 %v5423_v54  ;;  %v5461_v54 = vld [vmem:[%s6795_s17 + $0x50] sm:$0xff]  }
 0x603   : > { %4995 = vmatprep.subr.bf16.mxu0 %v5607_v1 }
 0x606   : > { %4996 = vmatpush3.bf16.msra.mxu0 %v5424_v55  ;;  %v5462_v55 = vld [vmem:[%s6795_s17 + $0x58] sm:$0xff]  }
 0x607   : > { %4997 = vmatprep.subr.bf16.mxu0 %v5607_v1 }
 0x60a   : > { %4998 = vmatpush3.bf16.msra.mxu0 %v5425_v57  ;;  %v5463_v57 = vld [vmem:[%s6795_s17 + $0x60] sm:$0xff]  }
 0x60b   : > { %4999 = vmatprep.subr.bf16.mxu0 %v5607_v1 }
 0x60e   : > { %5000 = vmatpush3.bf16.msra.mxu0 %v5426_v59  ;;  %v5465_v59 = vld [vmem:[%s6795_s17 + $0x70] sm:$0xff]  }
 0x60f   : > { %5005 = vmatprep.subr.bf16.mxu0 %v5607_v1 }
 0x611   : > { %5002 = vmatmul.mubr.msk.bf16.vlgmr.msra.gmra.mrb[20].mxu0 %vm4286_vm10, %v4287_v44 }
 0x612   : > { %5006 = vmatpush3.bf16.msra.mxu0 %v5427_v60  ;;  %5021 = vmatprep.mubr.msk.bf16.mxu0 %vm5608_vm8, %v5607_v1  ;;  %v5466_v60 = vld [vmem:[%s6795_s17 + $0x78] sm:$0xff]  }
 0x613   : > { %5007 = vmatprep.subr.bf16.mxu0 %v5607_v1 }
 0x616   : > { %5008 = vmatpush3.bf16.msra.mxu0 %v5428_v61 }
 0x617   : > { %5009 = vmatprep.subr.bf16.mxu0 %v5607_v1 }
 0x61a   : > { %5010 = vmatpush3.bf16.msra.mxu0 %v5429_v62 }
 0x61b   : > { %5011 = vmatprep.subr.bf16.mxu0 %v5607_v1 }
 0x61e   : > { %5012 = vmatpush3.bf16.msra.mxu0 %v5430_v63 }
 0x61f   : > { %5013 = vmatprep.subr.bf16.mxu0 %v5607_v1 }
 0x622   : > { %5014 = vmatpush3.bf16.msra.mxu0 %v5431_v0 }
 0x623   : > { %5015 = vmatprep.subr.bf16.mxu0 %v5607_v1 }
 0x626   : > { %5016 = vmatpush3.bf16.msra.mxu0 %v5432_v2 }
 0x627   : > { %5017 = vmatprep.subr.bf16.mxu0 %v5607_v1 }
 0x62a   : > { %5018 = vmatpush3.bf16.msra.mxu0 %v5433_v56 }
 0x62b   : > { %5019 = vmatprep.subr.bf16.mxu0 %v5607_v1 }
 0x62e   : > { %5020 = vmatpush3.bf16.msra.mxu0 %v5434_v3 }
 0x62f   : > { %5175 = vmatprep.subr.bf16.mxu0 %v5607_v1 }
 0x631   : > { %5022 = vmatmul.mubr.bf16.vlgmr.msra.gmra.mrb[20].mxu0 %v2090_v23  ;;  %v5435_v23 = vld [vmem:[%s6793_s15 + $0x40] sm:$0xff]  }
 0x632   : > { %5191 = vmatprep.mubr.msk.bf16.mxu0 %vm5608_vm8, %v5607_v1  ;;  %5176 = vmatpush3.bf16.msra.mxu0 %v5491_v6 }
 0x633   : > { %5177 = vmatprep.subr.bf16.mxu0 %v5607_v1 }
 0x704   : > { %v2871_v8 = vpop.f32.mrb[20].mxu0 }
 0x705   : > { %v5212_v9 = vadd.f32 %v5211_v7, %v2871_v8  ;;  %v5023_v10 = vpop.f32.mrb[21].mxu0  ;;  %v5493_v8 = vld [vmem:[#allocation6 + $0x10] sm:$0xff]  }
 0x706   : > { %v2874_v12 = vpop.f32.mrb[22].mxu0  ;;  %v5495_v10 = vld [vmem:[#allocation6 + $0x20] sm:$0xff]  }
 0x707   : > { %v5214_v13 = vadd.f32 %v5211_v7, %v2874_v12  ;;  %v5024_v14 = vpop.f32.mrb[23].mxu0  ;;  %v2880_v16 = vmax.f32 %v5212_v9, 0.0  ;;  %v5492_v7 = vld [vmem:[#allocation6 + $0x8] sm:$0xff]   ;;  %v5494_v9 = vld [vmem:[#allocation6 + $0x18] sm:$0xff]  }
 0x708   : > { %5178 = vmatpush3.bf16.msra.mxu0 %v5492_v7  ;;  %v5496_v12 = vld [vmem:[#allocation6 + $0x28] sm:$0xff]   ;;  %v4359_v14 = vld [vmem:[%s6794_s16] ss:$0 sm:$0xff] }
 0x709   : > { %v2881_v17 = vmax.f32 %v5214_v13, 0.0  ;;  %5179 = vmatprep.subr.bf16.mxu0 %v5607_v1 }
 0x70b   : > { %v5203_v19 = vpack.c.bf16 %v2881_v17, %v2880_v16 }
 0x70c   : > { %5180 = vmatpush3.bf16.msra.mxu0 %v5493_v8 }
 0x70d   : > { %5204 = vmatprep.subr.bf16.mxu1 %v5203_v19  ;;  %5181 = vmatprep.subr.bf16.mxu0 %v5607_v1 }
 0x70e   : > { %5206 = vmatpush3.bf16.msra.mxu1 %v5203_v19 }
 0x70f   : > { %5035 = vmatprep.subr.bf16.mxu1 %v5607_v1 }
 0x710   : > { %5182 = vmatpush3.bf16.msra.mxu0 %v5494_v9  ;;  %v3868_v9 = vld [vmem:[%s6842_s20] sm:$0x1] }
 0x711   : > { %5030 = vmatmul.mubr.msk.f32.vlgmr.msra.gmra.mrb[16].mxu1 %vm2886_vm11, %v2883_v22  ;;  %5183 = vmatprep.subr.bf16.mxu0 %v5607_v1 }
 0x712   : > { %5032 = vmatprep.mubr.msk.f32.mxu1 %vm2886_vm11, %v2884_v25  ;;  %5036 = vmatpush3.bf16.msra.mxu1 %v5435_v23 }
 0x713   : > { %5037 = vmatprep.subr.bf16.mxu1 %v5607_v1 }
 0x714   : > { %5184 = vmatpush3.bf16.msra.mxu0 %v5495_v10 }
 0x715   : > { %5033 = vmatmul.mubr.msk.f32.gmra.mrb[18].mxu1 %vm2886_vm11, %v2885_v26  ;;  %5185 = vmatprep.subr.bf16.mxu0 %v5607_v1  ;;  %v5467_v26 = vld [vmem:[%s6795_s17] sm:$0xff]  }
 0x716   : > { %5038 = vmatpush3.bf16.msra.mxu1 %v5436_v27  ;;  %5051 = vmatprep.mubr.msk.bf16.mxu1 %vm5608_vm8, %v5607_v1 }
 0x717   : > { %5039 = vmatprep.subr.bf16.mxu1 %v5607_v1 }
 0x718   : > { %5186 = vmatpush3.bf16.msra.mxu0 %v5496_v12  ;;  %v3872_v12 = vsub.s32 0, %v5874_v11 }
 0x719   : > { %5187 = vmatprep.subr.bf16.mxu0 %v5607_v1 }
 0x71a   : > { %5040 = vmatpush3.bf16.msra.mxu1 %v5437_v28  ;;  %v5468_v28 = vld [vmem:[%s6795_s17 + $0x8] sm:$0xff]  }
 0x71b   : > { %5041 = vmatprep.subr.bf16.mxu1 %v5607_v1 }
 0x71e   : > { %5042 = vmatpush3.bf16.msra.mxu1 %v5438_v29  ;;  %v5469_v29 = vld [vmem:[%s6795_s17 + $0x10] sm:$0xff]  }
 0x71f   : > { %5043 = vmatprep.subr.bf16.mxu1 %v5607_v1 }
 0x722   : > { %5044 = vmatpush3.bf16.msra.mxu1 %v5439_v30  ;;  %v5470_v30 = vld [vmem:[%s6795_s17 + $0x18] sm:$0xff]  }
 0x723   : > { %5045 = vmatprep.subr.bf16.mxu1 %v5607_v1 }
 0x726   : > { %5046 = vmatpush3.bf16.msra.mxu1 %v5440_v15  ;;  %v5471_v15 = vld [vmem:[%s6795_s17 + $0x20] sm:$0xff]  }
 0x727   : > { %5047 = vmatprep.subr.bf16.mxu1 %v5607_v1 }
 0x72a   : > { %5048 = vmatpush3.bf16.msra.mxu1 %v5441_v31  ;;  %v5472_v31 = vld [vmem:[%s6795_s17 + $0x28] sm:$0xff]  }
 0x72b   : > { %5049 = vmatprep.subr.bf16.mxu1 %v5607_v1 }
 0x72e   : > { %5050 = vmatpush3.bf16.msra.mxu1 %v5442_v18  ;;  %v5473_v18 = vld [vmem:[%s6795_s17 + $0x30] sm:$0xff]  }
 0x72f   : > { %5055 = vmatprep.subr.bf16.mxu1 %v5607_v1 }
 0x7e4   : > { %v5031_v20 = vpop.f32.mrb[16].mxu1 }
 0x7e5   : > { %v2985_v32 = vpack.c.bf16 %v5031_v20, %v5031_v20  ;;  %v2965_v33 = vpop.f32.mrb[17].mxu1  ;;  %v5474_v20 = vld [vmem:[%s6795_s17 + $0x38] sm:$0xff]  }
 0x7e6   : > { %v2984_v44 = vpack.c.bf16 %v2965_v33, %v2965_v33 }
 0x7e7   : > { %5052 = vmatmul.mubr.bf16.vlgmr.msra.gmra.mrb[20].mxu1 %v2985_v32  ;;  %v5475_v32 = vld [vmem:[%s6795_s17 + $0x80] sm:$0xff]  }
 0x7e8   : > { %5056 = vmatpush3.bf16.msra.mxu1 %v5443_v21  ;;  %5071 = vmatprep.mubr.msk.bf16.mxu1 %vm5608_vm8, %v5607_v1  ;;  %v6545_v35 = vpop.f32.mrb[18].mxu1 }
 0x7e9   : > { %5057 = vmatprep.subr.bf16.mxu1 %v5607_v1  ;;  %v2975_v36 = vpop.f32.mrb[19].mxu1 }
 0x7ea   : > { %v2986_v52 = vpack.c.bf16 %v2975_v36, %v2975_v36  ;;  %v5477_v36 = vld [vmem:[%s6795_s17 + $0x90] sm:$0xff]  }
 0x7ec   : > { %5058 = vmatpush3.bf16.msra.mxu1 %v5444_v34  ;;  %v5476_v34 = vld [vmem:[%s6795_s17 + $0x88] sm:$0xff]  }
 0x7ed   : > { %5059 = vmatprep.subr.bf16.mxu1 %v5607_v1 }
 0x7f0   : > { %5060 = vmatpush3.bf16.msra.mxu1 %v5445_v37  ;;  %v5478_v37 = vld [vmem:[%s6795_s17 + $0x98] sm:$0xff]  }
 0x7f1   : > { %5061 = vmatprep.subr.bf16.mxu1 %v5607_v1 }
 0x7f4   : > { %5062 = vmatpush3.bf16.msra.mxu1 %v5446_v38  ;;  %v5479_v38 = vld [vmem:[%s6795_s17 + $0xa0] sm:$0xff]  }
 0x7f5   : > { %5063 = vmatprep.subr.bf16.mxu1 %v5607_v1 }
 0x7f8   : > { %5064 = vmatpush3.bf16.msra.mxu1 %v5447_v39  ;;  %v5480_v39 = vld [vmem:[%s6795_s17 + $0xa8] sm:$0xff]  }
 0x7f9   : > { %5065 = vmatprep.subr.bf16.mxu1 %v5607_v1 }
 0x7fc   : > { %5066 = vmatpush3.bf16.msra.mxu1 %v5448_v40  ;;  %v5481_v40 = vld [vmem:[%s6795_s17 + $0xb0] sm:$0xff]  }
 0x7fd   : > { %5067 = vmatprep.subr.bf16.mxu1 %v5607_v1 }
 0x800   : > { %5068 = vmatpush3.bf16.msra.mxu1 %v5449_v41  ;;  %v5482_v41 = vld [vmem:[%s6795_s17 + $0xb8] sm:$0xff]  }
 0x801   : > { %5069 = vmatprep.subr.bf16.mxu1 %v5607_v1 }
 0x804   : > { %5070 = vmatpush3.bf16.msra.mxu1 %v5450_v42 }
 0x805   : > { %5075 = vmatprep.subr.bf16.mxu1 %v5607_v1 }
 0x807   : > { %5072 = vmatmul.mubr.bf16.vlgmr.msra.gmra.mrb[24].mxu1 %v2984_v44 }
 0x808   : > { %5076 = vmatpush3.bf16.msra.mxu1 %v5451_v43  ;;  %5091 = vmatprep.mubr.msk.bf16.mxu1 %vm5608_vm8, %v5607_v1  ;;  %v5483_v43 = vld [vmem:[%s6839_s28] sm:$0xff]  }
 0x809   : > { %5077 = vmatprep.subr.bf16.mxu1 %v5607_v1 }
 0x80c   : > { %5078 = vmatpush3.bf16.msra.mxu1 %v5452_v45  ;;  %v5484_v45 = vld [vmem:[%s6839_s28 + $0x8] sm:$0xff]  }
 0x80d   : > { %5079 = vmatprep.subr.bf16.mxu1 %v5607_v1 }
 0x810   : > { %5080 = vmatpush3.bf16.msra.mxu1 %v5453_v46  ;;  %v5485_v46 = vld [vmem:[%s6839_s28 + $0x10] sm:$0xff]  }
 0x811   : > { %5081 = vmatprep.subr.bf16.mxu1 %v5607_v1 }
 0x814   : > { %5082 = vmatpush3.bf16.msra.mxu1 %v5454_v47  ;;  %v5486_v47 = vld [vmem:[%s6839_s28 + $0x18] sm:$0xff]  }
 0x815   : > { %5083 = vmatprep.subr.bf16.mxu1 %v5607_v1 }
 0x818   : > { %5084 = vmatpush3.bf16.msra.mxu1 %v5455_v48  ;;  %v5487_v48 = vld [vmem:[%s6839_s28 + $0x20] sm:$0xff]  }
 0x819   : > { %5085 = vmatprep.subr.bf16.mxu1 %v5607_v1 }
 0x81c   : > { %5086 = vmatpush3.bf16.msra.mxu1 %v5456_v49  ;;  %v5488_v49 = vld [vmem:[%s6839_s28 + $0x28] sm:$0xff]  }
 0x81d   : > { %5087 = vmatprep.subr.bf16.mxu1 %v5607_v1 }
 0x820   : > { %5088 = vmatpush3.bf16.msra.mxu1 %v5457_v50  ;;  %v5489_v50 = vld [vmem:[%s6839_s28 + $0x30] sm:$0xff]  }
 0x821   : > { %5089 = vmatprep.subr.bf16.mxu1 %v5607_v1 }
 0x824   : > { %5090 = vmatpush3.bf16.msra.mxu1 %v5458_v51  ;;  %v5490_v51 = vld [vmem:[%s6839_s28 + $0x38] sm:$0xff]  }
 0x825   : > { %5095 = vmatprep.subr.bf16.mxu1 %v5607_v1 }
 0x827   : > { %5092 = vmatmul.mubr.bf16.vlgmr.msra.gmra.mrb[28].mxu1 %v2986_v52  ;;  %v2987_v52 = vpack.c.bf16 %v6545_v35, %v6545_v35 }
 0x828   : > { %5111 = vmatprep.mubr.msk.bf16.mxu1 %vm5608_vm8, %v5607_v1  ;;  %5096 = vmatpush3.bf16.msra.mxu1 %v5459_v53  ;;  %v5497_v53 = vld [vmem:[#allocation6 + $0x30] sm:$0xff]  }
 0x829   : > { %5097 = vmatprep.subr.bf16.mxu1 %v5607_v1  ;;  %5188 = vmatpush3.bf16.msra.mxu0 %v5497_v53 }
 0x82a   : > { %5189 = vmatprep.subr.bf16.mxu0 %v5607_v1 }
 0x82c   : > { %5098 = vmatpush3.bf16.msra.mxu1 %v5460_v24  ;;  %v5498_v24 = vld [vmem:[#allocation6 + $0x38] sm:$0xff]  }
 0x82d   : > { %5099 = vmatprep.subr.bf16.mxu1 %v5607_v1  ;;  %5190 = vmatpush3.bf16.msra.mxu0 %v5498_v24 }
 0x830   : > { %5100 = vmatpush3.bf16.msra.mxu1 %v5461_v54  ;;  %v4422_v54 = vld [vmem:[%s6840_s5] ss:$0 sm:$0xff] }
 0x831   : > { %5101 = vmatprep.subr.bf16.mxu1 %v5607_v1 }
 0x834   : > { %5102 = vmatpush3.bf16.msra.mxu1 %v5462_v55  ;;  %v4423_v55 = vld [vmem:[%s6841_s25] ss:$0 sm:$0xff] }
 0x835   : > { %5103 = vmatprep.subr.bf16.mxu1 %v5607_v1 }
 0x838   : > { %5104 = vmatpush3.bf16.msra.mxu1 %v5463_v57  ;;  %v5215_v57 = vadd.f32 %v4423_v55, %v4422_v54 }
 0x839   : > { %5105 = vmatprep.subr.bf16.mxu1 %v5607_v1 }
 0x83c   : > { %5106 = vmatpush3.bf16.msra.mxu1 %v5464_v58 }
 0x83d   : > { %5107 = vmatprep.subr.bf16.mxu1 %v5607_v1 }
 0x840   : > { %5108 = vmatpush3.bf16.msra.mxu1 %v5465_v59 }
 0x841   : > { %5109 = vmatprep.subr.bf16.mxu1 %v5607_v1 }
 0x844   : > { %5110 = vmatpush3.bf16.msra.mxu1 %v5466_v60 }
 0x845   : > { %5115 = vmatprep.subr.bf16.mxu1 %v5607_v1 }
 0x8ba   : > { %v3103_v61 = vpop.f32.mrb[20].mxu1 }
 0x8bb   : > { %v5053_v62 = vpop.f32.mrb[21].mxu1 }
 0x8bc   : > { %v3106_v63 = vpop.f32.mrb[22].mxu1 }
 0x8bd   : > { %v5054_v0 = vpop.f32.mrb[23].mxu1 }
 0x8da   : > { %v3191_v2 = vpop.f32.mrb[24].mxu1 }
 0x8db   : > { %v3192_v56 = vadd.f32 %v3191_v2, %v3103_v61  ;;  %v5073_v3 = vpop.f32.mrb[25].mxu1 }
 0x8dc   : > { %v3194_v4 = vpop.f32.mrb[26].mxu1 }
 0x8dd   : > { %v5074_v5 = vpop.f32.mrb[27].mxu1 }
 0x8fa   : > { %v3296_v13 = vpop.f32.mrb[28].mxu1 }
 0x8fb   : > { %v3302_v16 = vadd.f32 %v3296_v13, %v3192_v56  ;;  %v5093_v17 = vpop.f32.mrb[29].mxu1 }
 0x8fc   : > { %v3299_v19 = vpop.f32.mrb[30].mxu1 }
 0x8fd   : > { %v3310_v22 = vadd.f32 %v4359_v14, %v3302_v16  ;;  %v5094_v23 = vpop.f32.mrb[31].mxu1 }
 0x8ff   : > { %v3311_v25 = vmax.f32 %v3310_v22, 0.0 }
 0x901   : > { %v3315_v27 = vpack.c.bf16 %v3311_v25, %v3311_v25  ;;  %v3312_v21 = vrot.slane %v3311_v25, 7  ;;  %v3316_v42 = vrot.slane %v3311_v25, 1 }
 0x903   : > { %5112 = vmatmul.mubr.bf16.vlgmr.msra.gmra.mrb[32].mxu1 %v3315_v27  ;;  %v4393_v33 = vpack.c.bf16 %v3312_v21, %v3312_v21  ;;  %v4420_v44 = vpack.c.bf16 %v3316_v42, %v3316_v42 }
 0x904   : > { %5116 = vmatpush3.bf16.msra.mxu1 %v5467_v26  ;;  %5131 = vmatprep.mubr.msk.bf16.mxu1 %vm5608_vm8, %v5607_v1 }
 0x905   : > { %5117 = vmatprep.subr.bf16.mxu1 %v5607_v1 }
 0x908   : > { %5118 = vmatpush3.bf16.msra.mxu1 %v5468_v28 }
 0x909   : > { %5119 = vmatprep.subr.bf16.mxu1 %v5607_v1 }
 0x90c   : > { %5120 = vmatpush3.bf16.msra.mxu1 %v5469_v29 }
 0x90d   : > { %5121 = vmatprep.subr.bf16.mxu1 %v5607_v1 }
 0x910   : > { %5122 = vmatpush3.bf16.msra.mxu1 %v5470_v30 }
 0x911   : > { %5123 = vmatprep.subr.bf16.mxu1 %v5607_v1 }
 0x914   : > { %5124 = vmatpush3.bf16.msra.mxu1 %v5471_v15 }
 0x915   : > { %5125 = vmatprep.subr.bf16.mxu1 %v5607_v1 }
 0x918   : > { %5126 = vmatpush3.bf16.msra.mxu1 %v5472_v31 }
 0x919   : > { %5127 = vmatprep.subr.bf16.mxu1 %v5607_v1 }
 0x91c   : > { %5128 = vmatpush3.bf16.msra.mxu1 %v5473_v18 }
 0x91d   : > { %5129 = vmatprep.subr.bf16.mxu1 %v5607_v1 }
 0x920   : > { %5130 = vmatpush3.bf16.msra.mxu1 %v5474_v20 }
 0x921   : > { %5135 = vmatprep.subr.bf16.mxu1 %v5607_v1 }
 0x923   : > { %5132 = vmatmul.mubr.msk.bf16.vlgmr.msra.gmra.mrb[32].mxu1 %vm4392_vm12, %v4393_v33 }
 0x924   : > { %5136 = vmatpush3.bf16.msra.mxu1 %v5475_v32  ;;  %5151 = vmatprep.mubr.msk.bf16.mxu1 %vm5608_vm8, %v5607_v1 }
 0x925   : > { %5137 = vmatprep.subr.bf16.mxu1 %v5607_v1 }
 0x928   : > { %5138 = vmatpush3.bf16.msra.mxu1 %v5476_v34 }
 0x929   : > { %5139 = vmatprep.subr.bf16.mxu1 %v5607_v1 }
 0x92c   : > { %5140 = vmatpush3.bf16.msra.mxu1 %v5477_v36 }
 0x92d   : > { %5141 = vmatprep.subr.bf16.mxu1 %v5607_v1 }
 0x930   : > { %5142 = vmatpush3.bf16.msra.mxu1 %v5478_v37 }
 0x931   : > { %5143 = vmatprep.subr.bf16.mxu1 %v5607_v1 }
 0x934   : > { %5144 = vmatpush3.bf16.msra.mxu1 %v5479_v38 }
 0x935   : > { %5145 = vmatprep.subr.bf16.mxu1 %v5607_v1 }
 0x938   : > { %5146 = vmatpush3.bf16.msra.mxu1 %v5480_v39 }
 0x939   : > { %5147 = vmatprep.subr.bf16.mxu1 %v5607_v1 }
 0x93c   : > { %5148 = vmatpush3.bf16.msra.mxu1 %v5481_v40 }
 0x93d   : > { %5149 = vmatprep.subr.bf16.mxu1 %v5607_v1 }
 0x940   : > { %5150 = vmatpush3.bf16.msra.mxu1 %v5482_v41 }
 0x941   : > { %5155 = vmatprep.subr.bf16.mxu1 %v5607_v1 }
 0x943   : > { %5152 = vmatmul.mubr.msk.bf16.vlgmr.msra.gmra.mrb[32].mxu1 %vm4419_vm13, %v4420_v44 }
 0x944   : > { %5156 = vmatpush3.bf16.msra.mxu1 %v5483_v43  ;;  %5171 = vmatprep.mubr.msk.bf16.mxu1 %vm5608_vm8, %v5607_v1 }
 0x945   : > { %5157 = vmatprep.subr.bf16.mxu1 %v5607_v1 }
 0x948   : > { %5158 = vmatpush3.bf16.msra.mxu1 %v5484_v45 }
 0x949   : > { %5159 = vmatprep.subr.bf16.mxu1 %v5607_v1 }
 0x94c   : > { %5160 = vmatpush3.bf16.msra.mxu1 %v5485_v46 }
 0x94d   : > { %5161 = vmatprep.subr.bf16.mxu1 %v5607_v1 }
 0x950   : > { %5162 = vmatpush3.bf16.msra.mxu1 %v5486_v47 }
 0x951   : > { %5163 = vmatprep.subr.bf16.mxu1 %v5607_v1 }
 0x954   : > { %5164 = vmatpush3.bf16.msra.mxu1 %v5487_v48 }
 0x955   : > { %5165 = vmatprep.subr.bf16.mxu1 %v5607_v1 }
 0x958   : > { %5166 = vmatpush3.bf16.msra.mxu1 %v5488_v49 }
 0x959   : > { %5167 = vmatprep.subr.bf16.mxu1 %v5607_v1 }
 0x95c   : > { %5168 = vmatpush3.bf16.msra.mxu1 %v5489_v50 }
 0x95d   : > { %5169 = vmatprep.subr.bf16.mxu1 %v5607_v1 }
 0x960   : > { %5170 = vmatpush3.bf16.msra.mxu1 %v5490_v51 }
 0x963   : > { %5172 = vmatmul.mubr.bf16.vlgmr.msra.gmra.mrb[32].mxu1 %v2987_v52 }
 0xa36   : > { %v3747_v58 = vpop.f32.mrb[32].mxu1 }
 0xa37   : > { %v5216_v59 = vadd.f32 %v5215_v57, %v3747_v58  ;;  %v5173_v35 = vpop.f32.mrb[33].mxu1 }
 0xa38   : > { %v3750_v60 = vpop.f32.mrb[34].mxu1 }
 0xa39   : > { %v3754_v61 = vmax.f32 %v5216_v59, 0.0  ;;  %v5174_v62 = vpop.f32.mrb[35].mxu1 }
 0xa3b   : > { %v3755_v1 = vpack.c.bf16 %v3754_v61, %v3754_v61 }
 0xa3d   : > { %5192 = vmatmul.mubr.bf16.vlgmr.msra.gmra.mrb[24].mxu0 %v3755_v1 }
 0xb10   : > { %v3854_v63 = vpop.f32.mrb[24].mxu0 }
 0xb11   : > { %v3860_v0 = vrot.slane %v3854_v63, 4  ;;  %v5193_v2 = vpop.f32.mrb[25].mxu0 }
 0xb12   : > { %v3857_v56 = vpop.f32.mrb[26].mxu0 }
 0xb13   : > { %v3861_v3 = vadd.f32 %v3860_v0, %v3854_v63  ;;  %v5194_v4 = vpop.f32.mrb[27].mxu0 }
 0xb15   : > { %v3862_v5 = vrot.slane %v3861_v3, 2 }
 0xb17   : > { %v3863_v6 = vadd.f32 %v3862_v5, %v3861_v3 }
 0xb19   : > { %v3864_v7 = vrot.slane %v3863_v6, 1 }
 0xb1b   : > { %v3865_v8 = vadd.f32 %v3864_v7, %v3863_v6 }
 0xb1d   : > { %v3867_v10 = vmul.f32 0.125, %v3865_v8 }
 0xb1f   : > { %v3869_v13 = vadd.f32 %v3868_v9, %v3867_v10 }
 0xb21   : > { %v3873_v14 = vrot.slane %v3869_v13, %v3872_v12 }
 0xb23   : > { %3874 = vst [vmem:[%s754_s6] sm:$0xff] %v3873_v14 }
 0xb24 PF: > { %s6844_s29 = sld [smem:[#allocation9_spill]] }
 0xb2a   : > { %s35_s4 = sadd.s32 1, %s6844_s29  }
 0xb2b   : > { %p32_p3 = scmp.ge.s32.totalorder %s35_s4, 4  }
 0xb2d   :  { %34 = sbr.rel (!%p32_p3) target bundleno = 16 (0x10), region = 169 }
 0xb34   :  { %3894 = vsyncpa [#allocation3], 1 }
 0xb35   :  { %3896 = vsyncpa [#allocation3 + $0x1], 1 }
 0xb36   :  { %3897 = vsyncpa [#allocation5], 1 }

</bundles_post_ra>
